<compile_context>
chip_gen: v7x
topology: tpu7x:2x2x1
jax: 0.10.0
libtpu: 0.0.40
codegen_flags: <defaults>
</compile_context>

<pallas_src>
import functools

import jax
import jax.numpy as jnp
from jax import lax
from jax.experimental import pallas as pl
from jax.experimental.pallas import tpu as pltpu

BN_EPS = 1e-5
LANE = 128


def _conv_tile(x_ref, w_ref, hout, wout, cin):
    """3x3 / stride-1 conv of one padded image tile via in-kernel im2col.

    x_ref: (1, Hp, Wp, Cin) bf16 block (already spatially zero-padded)
    w_ref: (9*Cin, Cp)      bf16 block, HWIO flattened, Cout zero-padded
    returns (hout*wout, Cp) f32 conv output (conv bias omitted: cancelled by BN).
    """
    cp = w_ref.shape[-1]
    m = hout * wout
    # Upcast the (small) image tile to f32 so the shifted slices / reshapes
    # below stay on the native f32 layout path; the MXU operands are cast back
    # to bf16 right before the dot (exact: values were bf16-rounded already).
    x_img = x_ref[0].astype(jnp.float32)                       # (Hp, Wp, Cin)
    acc = jnp.zeros((m, cp), jnp.float32)
    # 9 shifted slices x 9 MXU dots accumulated in f32.
    # TODO(synk): for larger Cin, concatenate the slices into a single
    # (m, 9*Cin) patch matrix (or add a K-tiled grid axis) so each MXU pass
    # sees a deeper contraction (v6e/v7x 256-wide MXU under-feeding).
    for ky in range(3):
        for kx in range(3):
            tap = ky * 3 + kx
            xs = x_img[ky:ky + hout, kx:kx + wout, :].reshape(m, cin)
            acc = acc + jnp.dot(xs.astype(jnp.bfloat16),
                                w_ref[tap * cin:(tap + 1) * cin, :],
                                preferred_element_type=jnp.float32)
    return acc


def _stats_kernel(x_ref, w_ref, s_ref, ss_ref, *, hout, wout, cin):
    """Pass 1: accumulate per-channel sum / sum-of-squares of the conv output."""
    @pl.when(pl.program_id(0) == 0)
    def _():
        s_ref[...] = jnp.zeros_like(s_ref)
        ss_ref[...] = jnp.zeros_like(ss_ref)

    acc = _conv_tile(x_ref, w_ref, hout, wout, cin)            # (m, Cp) f32
    # Both moments come from the same in-register read of `acc` (single pass).
    s_ref[...] += jnp.sum(acc, axis=0, keepdims=True)
    ss_ref[...] += jnp.sum(acc * acc, axis=0, keepdims=True)
    # TODO(synk): one-pass (E[x^2]-E[x]^2) variance can cancel catastrophically
    # for activations with large means; switch to a shifted / two-pass centered
    # variance when scaling this up.


def _apply_kernel(x_ref, w_ref, scale_ref, shift_ref, y_ref, *, hout, wout, cin):
    """Pass 2: recompute the conv tile, apply folded BN (one FMA) + ReLU."""
    acc = _conv_tile(x_ref, w_ref, hout, wout, cin)            # (m, Cp) f32
    y = jnp.maximum(acc * scale_ref[...] + shift_ref[...], 0.0)
    y_ref[...] = y.reshape(y_ref.shape).astype(y_ref.dtype)


@functools.partial(jax.jit, static_argnames=("padding",))
def block_forward(x_nchw, w_hwio, bias, gamma, beta, *, padding):
    """Forward of `Block`: (N, Cin, H, W) f32 -> (N, Cout, Hout, Wout) f32."""
    del bias  # exactly cancelled by BatchNorm's batch-mean subtraction
    n, cin, h, w = x_nchw.shape
    cout = w_hwio.shape[-1]
    hout, wout = h + 2 * padding - 2, w + 2 * padding - 2
    hp, wp = h + 2 * padding, w + 2 * padding
    m_img, m_total = hout * wout, n * hout * wout
    k = 9 * cin
    cp = ((cout + LANE - 1) // LANE) * LANE            # lane-dense channel pad

    # Layout glue (runs once, 1x the data): NCHW->NHWC, spatial zero-pad,
    # bf16 cast of the MXU operands.
    x_nhwc = jnp.transpose(x_nchw, (0, 2, 3, 1))
    x_pad = jnp.pad(x_nhwc, ((0, 0), (padding, padding), (padding, padding),
                             (0, 0))).astype(jnp.bfloat16)
    w_mat = jnp.pad(w_hwio.reshape(k, cout),
                    ((0, 0), (0, cp - cout))).astype(jnp.bfloat16)

    x_spec = pl.BlockSpec((1, hp, wp, cin), lambda i: (i, 0, 0, 0))
    w_spec = pl.BlockSpec((k, cp), lambda i: (0, 0))          # resident
    vec_spec = pl.BlockSpec((1, cp), lambda i: (0, 0))        # resident

    # VMEM budget: double-buffered image tile + resident weight + conv
    # accumulator/temps + double-buffered output tile, with headroom; capped
    # well under v7x's 64 MiB physical VMEM.
    resident_bytes = (2 * hp * wp * cin * 2          # bf16 activation stream
                      + k * cp * 2                   # bf16 weight (resident)
                      + 2 * m_img * cp * 4           # f32 conv acc + temps
                      + 2 * m_img * cp * 4)          # f32 output tile stream
    vmem_limit = int(min(max(4 * resident_bytes, 32 << 20), 48 << 20))

    # ---- pass 1: per-channel conv sum / sum-of-squares (resident accumulator)
    stats_kernel = functools.partial(_stats_kernel, hout=hout, wout=wout, cin=cin)
    s, ss = pl.pallas_call(
        stats_kernel,
        grid=(n,),
        in_specs=[x_spec, w_spec],
        out_specs=(vec_spec, vec_spec),
        out_shape=(jax.ShapeDtypeStruct((1, cp), jnp.float32),
                   jax.ShapeDtypeStruct((1, cp), jnp.float32)),
        compiler_params=pltpu.CompilerParams(
            dimension_semantics=("arbitrary",),      # resident accumulator
            vmem_limit_bytes=vmem_limit),
    )(x_pad, w_mat)

    # ---- fold BatchNorm (training-mode batch stats, biased var) into one FMA
    mean = s / m_total
    var = jnp.maximum(ss / m_total - mean * mean, 0.0)
    g = jnp.pad(gamma.reshape(1, cout), ((0, 0), (0, cp - cout)))
    b = jnp.pad(beta.reshape(1, cout), ((0, 0), (0, cp - cout)))
    scale = g * lax.rsqrt(var + BN_EPS)
    shift = b - mean * scale
    # TODO(synk): PyTorch training mode also updates running_mean/running_var;
    # the forward value does not depend on them, so they are not reproduced.

    # ---- pass 2: recompute conv tile, apply scale/shift + ReLU
    apply_kernel = functools.partial(_apply_kernel, hout=hout, wout=wout, cin=cin)
    y = pl.pallas_call(
        apply_kernel,
        grid=(n,),
        in_specs=[x_spec, w_spec, vec_spec, vec_spec],
        out_specs=pl.BlockSpec((1, hout, wout, cp), lambda i: (i, 0, 0, 0)),
        out_shape=jax.ShapeDtypeStruct((n, hout, wout, cp), jnp.float32),
        compiler_params=pltpu.CompilerParams(
            dimension_semantics=("parallel",),       # shards across v7x's 2 TCs
            vmem_limit_bytes=vmem_limit),
    )(x_pad, w_mat, scale, shift)

    # TODO(synk): when the consumer is another Block, keep the lane-dense
    # padded (N, Hout, Wout, Cp) layout and chain kernels on it; only de-pad /
    # transpose at the model boundary.
    # TODO(synk): for large images, add a halo'd H-tile grid axis (and
    # pipeline_mode=pl.Buffered(3) on the activation stream for v5e) instead of
    # one whole image per grid step.
    return jnp.transpose(y[..., :cout], (0, 3, 1, 2))          # back to NCHW


def _reference(x_nchw, w_hwio, bias, gamma, beta, padding, *,
               matmul_in_dtype=jnp.float32):
    """Pure-JAX reference (same math as PyTorch training-mode forward).

    matmul_in_dtype=bf16 rounds the conv inputs like the kernel's MXU operands
    (accumulation stays f32), which keeps the comparison tight."""
    rnd = lambda a: a.astype(matmul_in_dtype).astype(jnp.float32)
    x_nhwc = jnp.transpose(x_nchw, (0, 2, 3, 1))
    conv = lax.conv_general_dilated(
        rnd(x_nhwc), rnd(w_hwio), window_strides=(1, 1),
        padding=[(padding, padding), (padding, padding)],
        dimension_numbers=("NHWC", "HWIO", "NHWC"),
        precision=lax.Precision.HIGHEST,
    ) + bias.reshape(1, 1, 1, -1)
    mean = jnp.mean(conv, axis=(0, 1, 2), keepdims=True)
    var = jnp.mean(jnp.square(conv - mean), axis=(0, 1, 2), keepdims=True)
    y = (conv - mean) * lax.rsqrt(var + BN_EPS)
    y = y * gamma.reshape(1, 1, 1, -1) + beta.reshape(1, 1, 1, -1)
    y = jnp.maximum(y, 0.0)
    return jnp.transpose(y, (0, 3, 1, 2))


if __name__ == "__main__":
    # Block(in_channels=4, out_channels=8, padding=1) on a (2, 4, 16, 16) input.
    N, Cin, Cout, H, W, P = 2, 4, 8, 16, 16, 1

    key = jax.random.PRNGKey(0)
    kx, kw, kb, kg, kbe = jax.random.split(key, 5)

    x = jax.random.normal(kx, (N, Cin, H, W), jnp.float32)
    fan_in = Cin * 3 * 3
    bound = float(fan_in) ** -0.5
    w_hwio = jax.random.uniform(kw, (3, 3, Cin, Cout), jnp.float32, -bound, bound)
    bias = jax.random.uniform(kb, (Cout,), jnp.float32, -bound, bound)
    gamma = 1.0 + 0.1 * jax.random.normal(kg, (Cout,), jnp.float32)
    beta = 0.1 * jax.random.normal(kbe, (Cout,), jnp.float32)

    y = jax.block_until_ready(block_forward(x, w_hwio, bias, gamma, beta, padding=P))
    assert y.shape == (N, Cout, H + 2 * P - 2, W + 2 * P - 2)

    # Tight check against a reference whose conv inputs are rounded to bf16
    # exactly like the kernel's MXU operands (f32 accumulation in both).
    y_ref_bf16 = _reference(x, w_hwio, bias, gamma, beta, P,
                            matmul_in_dtype=jnp.bfloat16)
    assert jnp.allclose(y, y_ref_bf16, rtol=1e-3, atol=1e-3), \
        float(jnp.max(jnp.abs(y - y_ref_bf16)))

    # Sanity check against the full-f32 (PyTorch-faithful) reference; the gap
    # is only the bf16 rounding of the MXU operands.
    y_ref_f32 = _reference(x, w_hwio, bias, gamma, beta, P)
    assert jnp.allclose(y, y_ref_f32, rtol=1e-1, atol=1e-1), \
        float(jnp.max(jnp.abs(y - y_ref_f32)))

    print("KERNEL_OK")
</pallas_src>

<mosaic_0001>
module attributes {stable_mosaic.version = 11 : i64} {
  func.func @_apply_kernel(%arg0: i32, %arg1: memref<1x18x18x4xbf16, #tpu.memory_space<vmem>>, %arg2: memref<36x128xbf16, #tpu.memory_space<vmem>>, %arg3: memref<1x128xf32, #tpu.memory_space<vmem>>, %arg4: memref<1x128xf32, #tpu.memory_space<vmem>>, %arg5: memref<1x16x16x128xf32, #tpu.memory_space<vmem>>) attributes {dimension_semantics = [#tpu.dimension_semantics<parallel>], iteration_bounds = array<i64: 2>, scalar_prefetch = 0 : i64, scratch_operands = 0 : i64, tpu.core_type = #tpu.core_type<tc>, window_params = [{transform_indices = @transform_0, window_bounds = array<i64: 1, 18, 18, 4>}, {pipeline_mode = #tpu.pipeline_mode<synchronous>, transform_indices = @transform_1, window_bounds = array<i64: 36, 128>}, {pipeline_mode = #tpu.pipeline_mode<synchronous>, transform_indices = @transform_2, window_bounds = array<i64: 1, 128>}, {pipeline_mode = #tpu.pipeline_mode<synchronous>, transform_indices = @transform_3, window_bounds = array<i64: 1, 128>}, {transform_indices = @transform_4, window_bounds = array<i64: 1, 16, 16, 128>}]} {
    %c0 = arith.constant 0 : index
    %c0_0 = arith.constant 0 : index
    %c0_1 = arith.constant 0 : index
    %c0_2 = arith.constant 0 : index
    %0 = vector.load %arg1[%c0, %c0_0, %c0_1, %c0_2] : memref<1x18x18x4xbf16, #tpu.memory_space<vmem>>, vector<1x18x18x4xbf16>
    %1 = vector.shape_cast %0 : vector<1x18x18x4xbf16> to vector<18x18x4xbf16>
    %2 = arith.extf %1 : vector<18x18x4xbf16> to vector<18x18x4xf32>
    %cst = arith.constant 0.000000e+00 : f32
    %3 = vector.broadcast %cst : f32 to vector<256x128xf32>
    %4 = vector.extract_strided_slice %2 {offsets = [0, 0, 0], sizes = [16, 16, 4], strides = [1, 1, 1]} : vector<18x18x4xf32> to vector<16x16x4xf32>
    %5 = vector.shape_cast %4 : vector<16x16x4xf32> to vector<256x4xf32>
    %6 = arith.truncf %5 : vector<256x4xf32> to vector<256x4xbf16>
    %c0_3 = arith.constant 0 : index
    %c0_4 = arith.constant 0 : index
    %7 = vector.load %arg2[%c0_3, %c0_4] : memref<36x128xbf16, #tpu.memory_space<vmem>>, vector<4x128xbf16>
    %cst_5 = arith.constant dense<0.000000e+00> : vector<256x128xf32>
    %8 = tpu.matmul %6, %7, %cst_5 {dimension_numbers = #tpu.dot_dimension_numbers<[1], [0], [0], [1], [0, 0, 1, 1], [], []>} : vector<256x4xbf16>, vector<4x128xbf16>, vector<256x128xf32> -> vector<256x128xf32>
    %9 = arith.addf %3, %8 : vector<256x128xf32>
    %10 = vector.extract_strided_slice %2 {offsets = [0, 1, 0], sizes = [16, 16, 4], strides = [1, 1, 1]} : vector<18x18x4xf32> to vector<16x16x4xf32>
    %11 = vector.shape_cast %10 : vector<16x16x4xf32> to vector<256x4xf32>
    %12 = arith.truncf %11 : vector<256x4xf32> to vector<256x4xbf16>
    %c4 = arith.constant 4 : index
    %c0_6 = arith.constant 0 : index
    %13 = vector.load %arg2[%c4, %c0_6] : memref<36x128xbf16, #tpu.memory_space<vmem>>, vector<4x128xbf16>
    %cst_7 = arith.constant dense<0.000000e+00> : vector<256x128xf32>
    %14 = tpu.matmul %12, %13, %cst_7 {dimension_numbers = #tpu.dot_dimension_numbers<[1], [0], [0], [1], [0, 0, 1, 1], [], []>} : vector<256x4xbf16>, vector<4x128xbf16>, vector<256x128xf32> -> vector<256x128xf32>
    %15 = arith.addf %9, %14 : vector<256x128xf32>
    %16 = vector.extract_strided_slice %2 {offsets = [0, 2, 0], sizes = [16, 16, 4], strides = [1, 1, 1]} : vector<18x18x4xf32> to vector<16x16x4xf32>
    %17 = vector.shape_cast %16 : vector<16x16x4xf32> to vector<256x4xf32>
    %18 = arith.truncf %17 : vector<256x4xf32> to vector<256x4xbf16>
    %c8 = arith.constant 8 : index
    %c0_8 = arith.constant 0 : index
    %19 = vector.load %arg2[%c8, %c0_8] : memref<36x128xbf16, #tpu.memory_space<vmem>>, vector<4x128xbf16>
    %cst_9 = arith.constant dense<0.000000e+00> : vector<256x128xf32>
    %20 = tpu.matmul %18, %19, %cst_9 {dimension_numbers = #tpu.dot_dimension_numbers<[1], [0], [0], [1], [0, 0, 1, 1], [], []>} : vector<256x4xbf16>, vector<4x128xbf16>, vector<256x128xf32> -> vector<256x128xf32>
    %21 = arith.addf %15, %20 : vector<256x128xf32>
    %22 = vector.extract_strided_slice %2 {offsets = [1, 0, 0], sizes = [16, 16, 4], strides = [1, 1, 1]} : vector<18x18x4xf32> to vector<16x16x4xf32>
    %23 = vector.shape_cast %22 : vector<16x16x4xf32> to vector<256x4xf32>
    %24 = arith.truncf %23 : vector<256x4xf32> to vector<256x4xbf16>
    %c12 = arith.constant 12 : index
    %c0_10 = arith.constant 0 : index
    %25 = vector.load %arg2[%c12, %c0_10] : memref<36x128xbf16, #tpu.memory_space<vmem>>, vector<4x128xbf16>
    %cst_11 = arith.constant dense<0.000000e+00> : vector<256x128xf32>
    %26 = tpu.matmul %24, %25, %cst_11 {dimension_numbers = #tpu.dot_dimension_numbers<[1], [0], [0], [1], [0, 0, 1, 1], [], []>} : vector<256x4xbf16>, vector<4x128xbf16>, vector<256x128xf32> -> vector<256x128xf32>
    %27 = arith.addf %21, %26 : vector<256x128xf32>
    %28 = vector.extract_strided_slice %2 {offsets = [1, 1, 0], sizes = [16, 16, 4], strides = [1, 1, 1]} : vector<18x18x4xf32> to vector<16x16x4xf32>
    %29 = vector.shape_cast %28 : vector<16x16x4xf32> to vector<256x4xf32>
    %30 = arith.truncf %29 : vector<256x4xf32> to vector<256x4xbf16>
    %c16 = arith.constant 16 : index
    %c0_12 = arith.constant 0 : index
    %31 = vector.load %arg2[%c16, %c0_12] : memref<36x128xbf16, #tpu.memory_space<vmem>>, vector<4x128xbf16>
    %cst_13 = arith.constant dense<0.000000e+00> : vector<256x128xf32>
    %32 = tpu.matmul %30, %31, %cst_13 {dimension_numbers = #tpu.dot_dimension_numbers<[1], [0], [0], [1], [0, 0, 1, 1], [], []>} : vector<256x4xbf16>, vector<4x128xbf16>, vector<256x128xf32> -> vector<256x128xf32>
    %33 = arith.addf %27, %32 : vector<256x128xf32>
    %34 = vector.extract_strided_slice %2 {offsets = [1, 2, 0], sizes = [16, 16, 4], strides = [1, 1, 1]} : vector<18x18x4xf32> to vector<16x16x4xf32>
    %35 = vector.shape_cast %34 : vector<16x16x4xf32> to vector<256x4xf32>
    %36 = arith.truncf %35 : vector<256x4xf32> to vector<256x4xbf16>
    %c20 = arith.constant 20 : index
    %c0_14 = arith.constant 0 : index
    %37 = vector.load %arg2[%c20, %c0_14] : memref<36x128xbf16, #tpu.memory_space<vmem>>, vector<4x128xbf16>
    %cst_15 = arith.constant dense<0.000000e+00> : vector<256x128xf32>
    %38 = tpu.matmul %36, %37, %cst_15 {dimension_numbers = #tpu.dot_dimension_numbers<[1], [0], [0], [1], [0, 0, 1, 1], [], []>} : vector<256x4xbf16>, vector<4x128xbf16>, vector<256x128xf32> -> vector<256x128xf32>
    %39 = arith.addf %33, %38 : vector<256x128xf32>
    %40 = vector.extract_strided_slice %2 {offsets = [2, 0, 0], sizes = [16, 16, 4], strides = [1, 1, 1]} : vector<18x18x4xf32> to vector<16x16x4xf32>
    %41 = vector.shape_cast %40 : vector<16x16x4xf32> to vector<256x4xf32>
    %42 = arith.truncf %41 : vector<256x4xf32> to vector<256x4xbf16>
    %c24 = arith.constant 24 : index
    %c0_16 = arith.constant 0 : index
    %43 = vector.load %arg2[%c24, %c0_16] : memref<36x128xbf16, #tpu.memory_space<vmem>>, vector<4x128xbf16>
    %cst_17 = arith.constant dense<0.000000e+00> : vector<256x128xf32>
    %44 = tpu.matmul %42, %43, %cst_17 {dimension_numbers = #tpu.dot_dimension_numbers<[1], [0], [0], [1], [0, 0, 1, 1], [], []>} : vector<256x4xbf16>, vector<4x128xbf16>, vector<256x128xf32> -> vector<256x128xf32>
    %45 = arith.addf %39, %44 : vector<256x128xf32>
    %46 = vector.extract_strided_slice %2 {offsets = [2, 1, 0], sizes = [16, 16, 4], strides = [1, 1, 1]} : vector<18x18x4xf32> to vector<16x16x4xf32>
    %47 = vector.shape_cast %46 : vector<16x16x4xf32> to vector<256x4xf32>
    %48 = arith.truncf %47 : vector<256x4xf32> to vector<256x4xbf16>
    %c28 = arith.constant 28 : index
    %c0_18 = arith.constant 0 : index
    %49 = vector.load %arg2[%c28, %c0_18] : memref<36x128xbf16, #tpu.memory_space<vmem>>, vector<4x128xbf16>
    %cst_19 = arith.constant dense<0.000000e+00> : vector<256x128xf32>
    %50 = tpu.matmul %48, %49, %cst_19 {dimension_numbers = #tpu.dot_dimension_numbers<[1], [0], [0], [1], [0, 0, 1, 1], [], []>} : vector<256x4xbf16>, vector<4x128xbf16>, vector<256x128xf32> -> vector<256x128xf32>
    %51 = arith.addf %45, %50 : vector<256x128xf32>
    %52 = vector.extract_strided_slice %2 {offsets = [2, 2, 0], sizes = [16, 16, 4], strides = [1, 1, 1]} : vector<18x18x4xf32> to vector<16x16x4xf32>
    %53 = vector.shape_cast %52 : vector<16x16x4xf32> to vector<256x4xf32>
    %54 = arith.truncf %53 : vector<256x4xf32> to vector<256x4xbf16>
    %c32 = arith.constant 32 : index
    %c0_20 = arith.constant 0 : index
    %55 = vector.load %arg2[%c32, %c0_20] : memref<36x128xbf16, #tpu.memory_space<vmem>>, vector<4x128xbf16>
    %cst_21 = arith.constant dense<0.000000e+00> : vector<256x128xf32>
    %56 = tpu.matmul %54, %55, %cst_21 {dimension_numbers = #tpu.dot_dimension_numbers<[1], [0], [0], [1], [0, 0, 1, 1], [], []>} : vector<256x4xbf16>, vector<4x128xbf16>, vector<256x128xf32> -> vector<256x128xf32>
    %57 = arith.addf %51, %56 : vector<256x128xf32>
    %c0_22 = arith.constant 0 : index
    %c0_23 = arith.constant 0 : index
    %58 = vector.load %arg3[%c0_22, %c0_23] : memref<1x128xf32, #tpu.memory_space<vmem>>, vector<1x128xf32>
    %59 = vector.broadcast %58 : vector<1x128xf32> to vector<256x128xf32>
    %60 = arith.mulf %57, %59 : vector<256x128xf32>
    %c0_24 = arith.constant 0 : index
    %c0_25 = arith.constant 0 : index
    %61 = vector.load %arg4[%c0_24, %c0_25] : memref<1x128xf32, #tpu.memory_space<vmem>>, vector<1x128xf32>
    %62 = vector.broadcast %61 : vector<1x128xf32> to vector<256x128xf32>
    %63 = arith.addf %60, %62 : vector<256x128xf32>
    %cst_26 = arith.constant 0.000000e+00 : f32
    %64 = vector.broadcast %cst_26 : f32 to vector<256x128xf32>
    %65 = arith.maximumf %63, %64 : vector<256x128xf32>
    %66 = vector.shape_cast %65 : vector<256x128xf32> to vector<1x16x16x128xf32>
    %c0_27 = arith.constant 0 : index
    %c0_28 = arith.constant 0 : index
    %c0_29 = arith.constant 0 : index
    %c0_30 = arith.constant 0 : index
    %67 = vector.load %arg5[%c0_27, %c0_28, %c0_29, %c0_30] : memref<1x16x16x128xf32, #tpu.memory_space<vmem>>, vector<1x16x16x128xf32>
    tpu.vector_store %arg5[%c0_27, %c0_28, %c0_29, %c0_30], %66 {strides = array<i32>} : memref<1x16x16x128xf32, #tpu.memory_space<vmem>>, vector<1x16x16x128xf32>,
    return
  }
  func.func @transform_0(%arg0: i32) -> (i32, i32, i32, i32) {
    %c0_i32 = arith.constant 0 : i32
    %c0_i32_0 = arith.constant 0 : i32
    %c0_i32_1 = arith.constant 0 : i32
    %c0_i32_2 = arith.constant 0 : i32
    return %arg0, %c0_i32, %c0_i32_0, %c0_i32_1 : i32, i32, i32, i32
  }
  func.func @transform_1(%arg0: i32) -> (i32, i32) {
    %c0_i32 = arith.constant 0 : i32
    %c0_i32_0 = arith.constant 0 : i32
    %c0_i32_1 = arith.constant 0 : i32
    return %c0_i32, %c0_i32_0 : i32, i32
  }
  func.func @transform_2(%arg0: i32) -> (i32, i32) {
    %c0_i32 = arith.constant 0 : i32
    %c0_i32_0 = arith.constant 0 : i32
    %c0_i32_1 = arith.constant 0 : i32
    return %c0_i32, %c0_i32_0 : i32, i32
  }
  func.func @transform_3(%arg0: i32) -> (i32, i32) {
    %c0_i32 = arith.constant 0 : i32
    %c0_i32_0 = arith.constant 0 : i32
    %c0_i32_1 = arith.constant 0 : i32
    return %c0_i32, %c0_i32_0 : i32, i32
  }
  func.func @transform_4(%arg0: i32) -> (i32, i32, i32, i32) {
    %c0_i32 = arith.constant 0 : i32
    %c0_i32_0 = arith.constant 0 : i32
    %c0_i32_1 = arith.constant 0 : i32
    %c0_i32_2 = arith.constant 0 : i32
    return %arg0, %c0_i32, %c0_i32_0, %c0_i32_1 : i32, i32, i32, i32
  }
}

module attributes {stable_mosaic.version = 11 : i64} {
  func.func @_stats_kernel(%arg0: i32, %arg1: memref<1x18x18x4xbf16, #tpu.memory_space<vmem>>, %arg2: memref<36x128xbf16, #tpu.memory_space<vmem>>, %arg3: memref<1x128xf32, #tpu.memory_space<vmem>>, %arg4: memref<1x128xf32, #tpu.memory_space<vmem>>) attributes {dimension_semantics = [#tpu.dimension_semantics<arbitrary>], iteration_bounds = array<i64: 2>, scalar_prefetch = 0 : i64, scratch_operands = 0 : i64, tpu.core_type = #tpu.core_type<tc>, window_params = [{transform_indices = @transform_0, window_bounds = array<i64: 1, 18, 18, 4>}, {pipeline_mode = #tpu.pipeline_mode<synchronous>, transform_indices = @transform_1, window_bounds = array<i64: 36, 128>}, {pipeline_mode = #tpu.pipeline_mode<synchronous>, transform_indices = @transform_2, window_bounds = array<i64: 1, 128>}, {pipeline_mode = #tpu.pipeline_mode<synchronous>, transform_indices = @transform_3, window_bounds = array<i64: 1, 128>}]} {
    %c0_i32 = arith.constant 0 : i32
    %0 = arith.cmpi eq, %arg0, %c0_i32 : i32
    %1 = arith.extui %0 : i1 to i32
    %c0_i32_0 = arith.constant 0 : i32
    %2 = arith.cmpi ne, %1, %c0_i32_0 : i32
    scf.if %2 {
      %cst_33 = arith.constant 0.000000e+00 : f32
      %72 = vector.broadcast %cst_33 : f32 to vector<1x128xf32>
      %c0_34 = arith.constant 0 : index
      %c0_35 = arith.constant 0 : index
      %73 = vector.load %arg3[%c0_34, %c0_35] : memref<1x128xf32, #tpu.memory_space<vmem>>, vector<1x128xf32>
      tpu.vector_store %arg3[%c0_34, %c0_35], %72 {strides = array<i32>} : memref<1x128xf32, #tpu.memory_space<vmem>>, vector<1x128xf32>,
      %cst_36 = arith.constant 0.000000e+00 : f32
      %74 = vector.broadcast %cst_36 : f32 to vector<1x128xf32>
      %c0_37 = arith.constant 0 : index
      %c0_38 = arith.constant 0 : index
      %75 = vector.load %arg4[%c0_37, %c0_38] : memref<1x128xf32, #tpu.memory_space<vmem>>, vector<1x128xf32>
      tpu.vector_store %arg4[%c0_37, %c0_38], %74 {strides = array<i32>} : memref<1x128xf32, #tpu.memory_space<vmem>>, vector<1x128xf32>,
    } else {
    }
    %c0 = arith.constant 0 : index
    %c0_1 = arith.constant 0 : index
    %c0_2 = arith.constant 0 : index
    %c0_3 = arith.constant 0 : index
    %3 = vector.load %arg1[%c0, %c0_1, %c0_2, %c0_3] : memref<1x18x18x4xbf16, #tpu.memory_space<vmem>>, vector<1x18x18x4xbf16>
    %4 = vector.shape_cast %3 : vector<1x18x18x4xbf16> to vector<18x18x4xbf16>
    %5 = arith.extf %4 : vector<18x18x4xbf16> to vector<18x18x4xf32>
    %cst = arith.constant 0.000000e+00 : f32
    %6 = vector.broadcast %cst : f32 to vector<256x128xf32>
    %7 = vector.extract_strided_slice %5 {offsets = [0, 0, 0], sizes = [16, 16, 4], strides = [1, 1, 1]} : vector<18x18x4xf32> to vector<16x16x4xf32>
    %8 = vector.shape_cast %7 : vector<16x16x4xf32> to vector<256x4xf32>
    %9 = arith.truncf %8 : vector<256x4xf32> to vector<256x4xbf16>
    %c0_4 = arith.constant 0 : index
    %c0_5 = arith.constant 0 : index
    %10 = vector.load %arg2[%c0_4, %c0_5] : memref<36x128xbf16, #tpu.memory_space<vmem>>, vector<4x128xbf16>
    %cst_6 = arith.constant dense<0.000000e+00> : vector<256x128xf32>
    %11 = tpu.matmul %9, %10, %cst_6 {dimension_numbers = #tpu.dot_dimension_numbers<[1], [0], [0], [1], [0, 0, 1, 1], [], []>} : vector<256x4xbf16>, vector<4x128xbf16>, vector<256x128xf32> -> vector<256x128xf32>
    %12 = arith.addf %6, %11 : vector<256x128xf32>
    %13 = vector.extract_strided_slice %5 {offsets = [0, 1, 0], sizes = [16, 16, 4], strides = [1, 1, 1]} : vector<18x18x4xf32> to vector<16x16x4xf32>
    %14 = vector.shape_cast %13 : vector<16x16x4xf32> to vector<256x4xf32>
    %15 = arith.truncf %14 : vector<256x4xf32> to vector<256x4xbf16>
    %c4 = arith.constant 4 : index
    %c0_7 = arith.constant 0 : index
    %16 = vector.load %arg2[%c4, %c0_7] : memref<36x128xbf16, #tpu.memory_space<vmem>>, vector<4x128xbf16>
    %cst_8 = arith.constant dense<0.000000e+00> : vector<256x128xf32>
    %17 = tpu.matmul %15, %16, %cst_8 {dimension_numbers = #tpu.dot_dimension_numbers<[1], [0], [0], [1], [0, 0, 1, 1], [], []>} : vector<256x4xbf16>, vector<4x128xbf16>, vector<256x128xf32> -> vector<256x128xf32>
    %18 = arith.addf %12, %17 : vector<256x128xf32>
    %19 = vector.extract_strided_slice %5 {offsets = [0, 2, 0], sizes = [16, 16, 4], strides = [1, 1, 1]} : vector<18x18x4xf32> to vector<16x16x4xf32>
    %20 = vector.shape_cast %19 : vector<16x16x4xf32> to vector<256x4xf32>
    %21 = arith.truncf %20 : vector<256x4xf32> to vector<256x4xbf16>
    %c8 = arith.constant 8 : index
    %c0_9 = arith.constant 0 : index
    %22 = vector.load %arg2[%c8, %c0_9] : memref<36x128xbf16, #tpu.memory_space<vmem>>, vector<4x128xbf16>
    %cst_10 = arith.constant dense<0.000000e+00> : vector<256x128xf32>
    %23 = tpu.matmul %21, %22, %cst_10 {dimension_numbers = #tpu.dot_dimension_numbers<[1], [0], [0], [1], [0, 0, 1, 1], [], []>} : vector<256x4xbf16>, vector<4x128xbf16>, vector<256x128xf32> -> vector<256x128xf32>
    %24 = arith.addf %18, %23 : vector<256x128xf32>
    %25 = vector.extract_strided_slice %5 {offsets = [1, 0, 0], sizes = [16, 16, 4], strides = [1, 1, 1]} : vector<18x18x4xf32> to vector<16x16x4xf32>
    %26 = vector.shape_cast %25 : vector<16x16x4xf32> to vector<256x4xf32>
    %27 = arith.truncf %26 : vector<256x4xf32> to vector<256x4xbf16>
    %c12 = arith.constant 12 : index
    %c0_11 = arith.constant 0 : index
    %28 = vector.load %arg2[%c12, %c0_11] : memref<36x128xbf16, #tpu.memory_space<vmem>>, vector<4x128xbf16>
    %cst_12 = arith.constant dense<0.000000e+00> : vector<256x128xf32>
    %29 = tpu.matmul %27, %28, %cst_12 {dimension_numbers = #tpu.dot_dimension_numbers<[1], [0], [0], [1], [0, 0, 1, 1], [], []>} : vector<256x4xbf16>, vector<4x128xbf16>, vector<256x128xf32> -> vector<256x128xf32>
    %30 = arith.addf %24, %29 : vector<256x128xf32>
    %31 = vector.extract_strided_slice %5 {offsets = [1, 1, 0], sizes = [16, 16, 4], strides = [1, 1, 1]} : vector<18x18x4xf32> to vector<16x16x4xf32>
    %32 = vector.shape_cast %31 : vector<16x16x4xf32> to vector<256x4xf32>
    %33 = arith.truncf %32 : vector<256x4xf32> to vector<256x4xbf16>
    %c16 = arith.constant 16 : index
    %c0_13 = arith.constant 0 : index
    %34 = vector.load %arg2[%c16, %c0_13] : memref<36x128xbf16, #tpu.memory_space<vmem>>, vector<4x128xbf16>
    %cst_14 = arith.constant dense<0.000000e+00> : vector<256x128xf32>
    %35 = tpu.matmul %33, %34, %cst_14 {dimension_numbers = #tpu.dot_dimension_numbers<[1], [0], [0], [1], [0, 0, 1, 1], [], []>} : vector<256x4xbf16>, vector<4x128xbf16>, vector<256x128xf32> -> vector<256x128xf32>
    %36 = arith.addf %30, %35 : vector<256x128xf32>
    %37 = vector.extract_strided_slice %5 {offsets = [1, 2, 0], sizes = [16, 16, 4], strides = [1, 1, 1]} : vector<18x18x4xf32> to vector<16x16x4xf32>
    %38 = vector.shape_cast %37 : vector<16x16x4xf32> to vector<256x4xf32>
    %39 = arith.truncf %38 : vector<256x4xf32> to vector<256x4xbf16>
    %c20 = arith.constant 20 : index
    %c0_15 = arith.constant 0 : index
    %40 = vector.load %arg2[%c20, %c0_15] : memref<36x128xbf16, #tpu.memory_space<vmem>>, vector<4x128xbf16>
    %cst_16 = arith.constant dense<0.000000e+00> : vector<256x128xf32>
    %41 = tpu.matmul %39, %40, %cst_16 {dimension_numbers = #tpu.dot_dimension_numbers<[1], [0], [0], [1], [0, 0, 1, 1], [], []>} : vector<256x4xbf16>, vector<4x128xbf16>, vector<256x128xf32> -> vector<256x128xf32>
    %42 = arith.addf %36, %41 : vector<256x128xf32>
    %43 = vector.extract_strided_slice %5 {offsets = [2, 0, 0], sizes = [16, 16, 4], strides = [1, 1, 1]} : vector<18x18x4xf32> to vector<16x16x4xf32>
    %44 = vector.shape_cast %43 : vector<16x16x4xf32> to vector<256x4xf32>
    %45 = arith.truncf %44 : vector<256x4xf32> to vector<256x4xbf16>
    %c24 = arith.constant 24 : index
    %c0_17 = arith.constant 0 : index
    %46 = vector.load %arg2[%c24, %c0_17] : memref<36x128xbf16, #tpu.memory_space<vmem>>, vector<4x128xbf16>
    %cst_18 = arith.constant dense<0.000000e+00> : vector<256x128xf32>
    %47 = tpu.matmul %45, %46, %cst_18 {dimension_numbers = #tpu.dot_dimension_numbers<[1], [0], [0], [1], [0, 0, 1, 1], [], []>} : vector<256x4xbf16>, vector<4x128xbf16>, vector<256x128xf32> -> vector<256x128xf32>
    %48 = arith.addf %42, %47 : vector<256x128xf32>
    %49 = vector.extract_strided_slice %5 {offsets = [2, 1, 0], sizes = [16, 16, 4], strides = [1, 1, 1]} : vector<18x18x4xf32> to vector<16x16x4xf32>
    %50 = vector.shape_cast %49 : vector<16x16x4xf32> to vector<256x4xf32>
    %51 = arith.truncf %50 : vector<256x4xf32> to vector<256x4xbf16>
    %c28 = arith.constant 28 : index
    %c0_19 = arith.constant 0 : index
    %52 = vector.load %arg2[%c28, %c0_19] : memref<36x128xbf16, #tpu.memory_space<vmem>>, vector<4x128xbf16>
    %cst_20 = arith.constant dense<0.000000e+00> : vector<256x128xf32>
    %53 = tpu.matmul %51, %52, %cst_20 {dimension_numbers = #tpu.dot_dimension_numbers<[1], [0], [0], [1], [0, 0, 1, 1], [], []>} : vector<256x4xbf16>, vector<4x128xbf16>, vector<256x128xf32> -> vector<256x128xf32>
    %54 = arith.addf %48, %53 : vector<256x128xf32>
    %55 = vector.extract_strided_slice %5 {offsets = [2, 2, 0], sizes = [16, 16, 4], strides = [1, 1, 1]} : vector<18x18x4xf32> to vector<16x16x4xf32>
    %56 = vector.shape_cast %55 : vector<16x16x4xf32> to vector<256x4xf32>
    %57 = arith.truncf %56 : vector<256x4xf32> to vector<256x4xbf16>
    %c32 = arith.constant 32 : index
    %c0_21 = arith.constant 0 : index
    %58 = vector.load %arg2[%c32, %c0_21] : memref<36x128xbf16, #tpu.memory_space<vmem>>, vector<4x128xbf16>
    %cst_22 = arith.constant dense<0.000000e+00> : vector<256x128xf32>
    %59 = tpu.matmul %57, %58, %cst_22 {dimension_numbers = #tpu.dot_dimension_numbers<[1], [0], [0], [1], [0, 0, 1, 1], [], []>} : vector<256x4xbf16>, vector<4x128xbf16>, vector<256x128xf32> -> vector<256x128xf32>
    %60 = arith.addf %54, %59 : vector<256x128xf32>
    %c0_23 = arith.constant 0 : index
    %c0_24 = arith.constant 0 : index
    %61 = vector.load %arg3[%c0_23, %c0_24] : memref<1x128xf32, #tpu.memory_space<vmem>>, vector<1x128xf32>
    %cst_25 = arith.constant dense<0.000000e+00> : vector<128xf32>
    %62 = vector.multi_reduction <add>, %60, %cst_25 [0] : vector<256x128xf32> to vector<128xf32>
    %63 = vector.shape_cast %62 : vector<128xf32> to vector<1x128xf32>
    %64 = arith.addf %61, %63 : vector<1x128xf32>
    %c0_26 = arith.constant 0 : index
    %c0_27 = arith.constant 0 : index
    %65 = vector.load %arg3[%c0_26, %c0_27] : memref<1x128xf32, #tpu.memory_space<vmem>>, vector<1x128xf32>
    tpu.vector_store %arg3[%c0_26, %c0_27], %64 {strides = array<i32>} : memref<1x128xf32, #tpu.memory_space<vmem>>, vector<1x128xf32>,
    %c0_28 = arith.constant 0 : index
    %c0_29 = arith.constant 0 : index
    %66 = vector.load %arg4[%c0_28, %c0_29] : memref<1x128xf32, #tpu.memory_space<vmem>>, vector<1x128xf32>
    %67 = arith.mulf %60, %60 : vector<256x128xf32>
    %cst_30 = arith.constant dense<0.000000e+00> : vector<128xf32>
    %68 = vector.multi_reduction <add>, %67, %cst_30 [0] : vector<256x128xf32> to vector<128xf32>
    %69 = vector.shape_cast %68 : vector<128xf32> to vector<1x128xf32>
    %70 = arith.addf %66, %69 : vector<1x128xf32>
    %c0_31 = arith.constant 0 : index
    %c0_32 = arith.constant 0 : index
    %71 = vector.load %arg4[%c0_31, %c0_32] : memref<1x128xf32, #tpu.memory_space<vmem>>, vector<1x128xf32>
    tpu.vector_store %arg4[%c0_31, %c0_32], %70 {strides = array<i32>} : memref<1x128xf32, #tpu.memory_space<vmem>>, vector<1x128xf32>,
    return
  }
  func.func @transform_0(%arg0: i32) -> (i32, i32, i32, i32) {
    %c0_i32 = arith.constant 0 : i32
    %c0_i32_0 = arith.constant 0 : i32
    %c0_i32_1 = arith.constant 0 : i32
    %c0_i32_2 = arith.constant 0 : i32
    return %arg0, %c0_i32, %c0_i32_0, %c0_i32_1 : i32, i32, i32, i32
  }
  func.func @transform_1(%arg0: i32) -> (i32, i32) {
    %c0_i32 = arith.constant 0 : i32
    %c0_i32_0 = arith.constant 0 : i32
    %c0_i32_1 = arith.constant 0 : i32
    return %c0_i32, %c0_i32_0 : i32, i32
  }
  func.func @transform_2(%arg0: i32) -> (i32, i32) {
    %c0_i32 = arith.constant 0 : i32
    %c0_i32_0 = arith.constant 0 : i32
    %c0_i32_1 = arith.constant 0 : i32
    return %c0_i32, %c0_i32_0 : i32, i32
  }
  func.func @transform_3(%arg0: i32) -> (i32, i32) {
    %c0_i32 = arith.constant 0 : i32
    %c0_i32_0 = arith.constant 0 : i32
    %c0_i32_1 = arith.constant 0 : i32
    return %c0_i32, %c0_i32_0 : i32, i32
  }
}

</mosaic_0001>

<bundles_post_ra>
// kernel: block_forward.3
= control target key start
LH: loop header
LB: loop body
LE: loop exit
PB: predicated region body
PF: predicated region fallthrough
CT: control target
= control target key end

     0   :  { %s3743_s15 = smov 0   ;;  %s4746_s0 = inlined_call_operand.vmem [shape: bf16[2,18,18,4], index: 0, kind: input, shape index: {}]   ;;  %s4747_s1 = inlined_call_operand.vmem [shape: bf16[36,128], index: 1, kind: input, shape index: {}]   ;;  %s4748_s2 = inlined_call_operand.vmem [shape: f32[1,128], index: 2, kind: input, shape index: {}]   ;;  %s4749_s3 = inlined_call_operand.vmem [shape: f32[1,128], index: 3, kind: input, shape index: {}]   ;;  %s4750_s4 = inlined_call_operand.vmem [shape: f32[2,16,16,128], index: 4, kind: output, shape index: {}]  }
   0x1 LB: > { %s2755_s16 = sadd.s32 4294967295, %s3716_s15   ;;  %p2759_p0 = scmp.ge.s32.totalorder %s3716_s15, 1  ;;  %s3716_s15 = sphi %s3743_s15, %s14_s15  }
   0x2   : > { %p162_p1 = scmp.lt.s32.totalorder %s3716_s15, 3 }
   0x4   : > { %p163_p2 = pnand %p2759_p0, %p162_p1 }
   0x6   : > { %166 = sbr.rel (%p163_p2) target bundleno = 536 (0x218), region = 36 }
   0xd   : > { %v3670_v0 = vld [vmem:[%s4747_s1] ss:$0 sps:$4 sm:$0xcc]   ;;  %vm555_vm0 = vcmask 1041408   ;;  %v3757_v1 = vld [vmem:[%s4747_s1 + $0x8] sm:$0x3] }
   0xe   : > { %p188_p3 = scmp.lt.s32.totalorder %s2755_s16, 1  ;;  %v505_v2 = vrot.slane %v3670_v0, 2  ;;  %3655 = vmatprep.subr.msk.bf16.mxu0 %vm555_vm0, %v3757_v1  ;;  %v3763_v3 = vsel %vm555_vm0, %v3757_v1, 0  ;;  %v323_v4 = vld [vmem:[%s4747_s1] sm:$0x3]  ;;  %vm372_vm1 = vcmask 1046528  }
   0xf   : > { %4789 = vst [vmem:[#allocation2_spill] sm:$0xff] %v3763_v3  ;;  %3224 = vmatpush3.bf16.msra.mxu0 %v3763_v3  ;;  %v3672_v5 = vld [vmem:[%s4747_s1 + $0x8] ss:$0 sps:$4 sm:$0xcc]   ;;  %vm506_vm2 = vcmask 31744   ;;  %v769_v39 = vsel %vm555_vm0, %v323_v4, 0 }
  0x10   : > { %s4835_s16 = smov (!%p188_p3, %s2755_s16), 1  ;;  %3651 = vmatprep.subr.msk.bf16.mxu1 %vm555_vm0, %v505_v2  ;;  %v557_v6 = vsel %vm555_vm0, %v505_v2, 0  ;;  %v1734_v7 = vrot.slane %v3672_v5, 2  ;;  %v3853_v46 = vld [vmem:[%s4747_s1 + $0x4] sm:$0x3]  ;;  %vm932_vm3 = vcmask 1045504  }
  0x11   : > { %3088 = vmatpush3.bf16.msra.mxu1 %v557_v6  ;;  %s3661_s25 = smul.u32 216, %s4835_s16  ;;  %v3897_v5 = vld [vmem:[%s4747_s1 + $0xc] sm:$0x3]  ;;  %s2933_s19 = sshll.u32 %s4835_s16, 8 }
  0x12   : > { %3652 = vmatprep.subr.msk.bf16.mxu1 %vm555_vm0, %v323_v4  ;;  %3657 = vmatprep.subr.msk.bf16.mxu0 %vm555_vm0, %v1734_v7  ;;  %v1739_v45 = vsel %vm555_vm0, %v1734_v7, 0  ;;  %s4643_s22 = scalar_lea.vmem %s4750_s4, %s2933_s19 }
  0x13   : > { %s3781_s28 = scalar_lea.vmem %s4746_s0, %s3661_s25 }
  0x14   : > { %v3785_v8 = vld [vmem:[%s3781_s28] sm:$0xff]   ;;  %v3788_v9 = vld [vmem:[%s3781_s28 + $0x8] sm:$0x1]  ;;  %v3791_v10 = vld [vmem:[%s3781_s28 + $0xc] sm:$0xff]  }
  0x15   : > { %v4753_v11 = vunpack.c.l.bf16 %v3785_v8  ;;  %v4752_v12 = vunpack.c.h.bf16 %v3785_v8  ;;  %v4751_v13 = vunpack.c.l.bf16 %v3788_v9  ;;  %v3797_v14 = vld [vmem:[%s3781_s28 + $0x14] sm:$0x1]  ;;  %v256_v15 = vunpack.c.l.bf16 %v3791_v10  ;;  %v3801_v16 = vld [vmem:[%s3781_s28 + $0x18] sm:$0xff]   ;;  %v3817_v25 = vld [vmem:[%s3781_s28 + $0x20] sm:$0x1] }
  0x16   : > { %v257_v17 = vunpack.c.h.bf16 %v3791_v10  ;;  %v258_v18 = vunpack.c.l.bf16 %v3797_v14  ;;  %v259_v22 = vunpack.c.l.bf16 %v3801_v16  ;;  %v3824_v29 = vld [vmem:[%s3781_s28 + $0x24] sm:$0xff]   ;;  %v260_v33 = vunpack.c.h.bf16 %v3801_v16  ;;  %v3833_v36 = vld [vmem:[%s3781_s28 + $0x2c] sm:$0x1]  ;;  %v3836_v37 = vld [vmem:[%s3781_s28 + $0x30] sm:$0xff]  }
  0x17   : > { %v373_v19 = vrot.slane %v4753_v11, 1  ;;  %v374_v20 = vrot.slane %v4752_v12, 1  ;;  %v376_v21 = vrot.slane %v4751_v13, 1  ;;  %v378_v23 = vrot.slane %v256_v15, 1  ;;  %v3843_v42 = vld [vmem:[%s3781_s28 + $0x38] sm:$0x1] }
  0x18   : > { %v379_v24 = vrot.slane %v257_v17, 1  ;;  %v381_v28 = vrot.slane %v258_v18, 1  ;;  %v261_v34 = vunpack.c.l.bf16 %v3817_v25  ;;  %v383_v35 = vrot.slane %v259_v22, 1  ;;  %v3864_v51 = vld [vmem:[%s3781_s28 + $0x3c] sm:$0xff]   ;;  %v3871_v56 = vld [vmem:[%s3781_s28 + $0x44] sm:$0x1] }
  0x19   : > { %v375_v26 = vsel %vm372_vm1, %v373_v19, %v374_v20  ;;  %v377_v27 = vsel %vm372_vm1, %v374_v20, %v376_v21  ;;  %v262_v40 = vunpack.c.l.bf16 %v3824_v29  ;;  %v263_v41 = vunpack.c.h.bf16 %v3824_v29  ;;  %v3874_v57 = vld [vmem:[%s3781_s28 + $0x48] sm:$0xff]   ;;  %v3892_v4 = vld [vmem:[%s3781_s28 + $0x50] sm:$0x1]  ;;  %v3908_v21 = vld [vmem:[%s3781_s28 + $0x54] sm:$0xff]  }
  0x1a   : > { %v485_v30 = vpack.c.bf16 %v377_v27, %v375_v26  ;;  %v380_v31 = vsel %vm372_vm1, %v378_v23, %v379_v24  ;;  %v382_v32 = vsel %vm372_vm1, %v379_v24, %v381_v28  ;;  %v384_v43 = vrot.slane %v260_v33, 1  ;;  %v3917_v28 = vld [vmem:[%s3781_s28 + $0x5c] sm:$0x1] }
  0x1b   : > { %v486_v38 = vpack.c.bf16 %v382_v32, %v380_v31  ;;  %v386_v44 = vrot.slane %v261_v34, 1  ;;  %v264_v47 = vunpack.c.l.bf16 %v3833_v36  ;;  %v388_v48 = vrot.slane %v262_v40, 1 }
  0x1c   : > { %3089 = vmatprep.mubr.msk.bf16.mxu1 %vm506_vm2, %v485_v30  ;;  %v389_v49 = vrot.slane %v263_v41, 1  ;;  %v265_v50 = vunpack.c.l.bf16 %v3836_v37  ;;  %v385_v52 = vsel %vm372_vm1, %v383_v35, %v384_v43  ;;  %v266_v54 = vunpack.c.h.bf16 %v3836_v37 }
  0x1d   : > { %3225 = vmatprep.mubr.msk.bf16.mxu0 %vm506_vm2, %v486_v38  ;;  %3090 = vmatmul.mubr.msk.bf16.vlgmr.msra.gmra.mrb[0].mxu1 %vm506_vm2, %v486_v38  ;;  %v387_v53 = vsel %vm372_vm1, %v384_v43, %v386_v44  ;;  %v267_v55 = vunpack.c.l.bf16 %v3843_v42  ;;  %v391_v60 = vrot.slane %v264_v47, 1  ;;  %v268_v0 = vunpack.c.l.bf16 %v3864_v51 }
  0x1e   : > { %3122 = vmatpush3.bf16.msra.mxu1 %v769_v39  ;;  %v3876_v58 = vpack.c.bf16 %v387_v53, %v385_v52  ;;  %v390_v59 = vsel %vm372_vm1, %v388_v48, %v389_v49  ;;  %v393_v61 = vrot.slane %v265_v50, 1  ;;  %v394_v62 = vrot.slane %v266_v54, 1  ;;  %v3944_v53 = vld [vmem:[%s3781_s28 + $0x60] sm:$0xff]  }
  0x1f   : > { %3653 = vmatprep.subr.msk.bf16.mxu1 %vm555_vm0, %v3853_v46  ;;  %v396_v63 = vrot.slane %v267_v55, 1  ;;  %v269_v2 = vunpack.c.h.bf16 %v3864_v51  ;;  %v392_v6 = vsel %vm372_vm1, %v389_v49, %v391_v60  ;;  %v4769_v7 = vunpack.c.l.bf16 %v3871_v56  ;;  %v3951_v60 = vld [vmem:[%s3781_s28 + $0x68] sm:$0x1] }
  0x20   : > { %3226 = vmatmul.mubr.msk.bf16.vlgmr.msra.gmra.mrb[0].mxu0 %vm506_vm2, %v3876_v58  ;;  %3093 = vmatprep.mubr.msk.bf16.mxu1 %vm506_vm2, %v3876_v58  ;;  %v4768_v19 = vunpack.c.l.bf16 %v3874_v57  ;;  %v4763_v20 = vunpack.c.h.bf16 %v3874_v57  ;;  %v3910_v23 = vpack.c.bf16 %v392_v6, %v390_v59  ;;  %v395_v24 = vsel %vm372_vm1, %v393_v61, %v394_v62 }
  0x21   : > { %3258 = vmatpush3.bf16.msra.mxu0 %v1739_v45  ;;  %v397_v26 = vsel %vm372_vm1, %v394_v62, %v396_v63  ;;  %v398_v27 = vrot.slane %v268_v0, 1  ;;  %v399_v31 = vrot.slane %v269_v2, 1  ;;  %v401_v32 = vrot.slane %v4769_v7, 1 }
  0x22   : > { %v3919_v30 = vpack.c.bf16 %v397_v26, %v395_v24  ;;  %v4760_v35 = vunpack.c.l.bf16 %v3892_v4  ;;  %3658 = vmatprep.subr.msk.bf16.mxu0 %vm555_vm0, %v3897_v5  ;;  %3229 = vmatprep.mubr.msk.bf16.mxu0 %vm506_vm2, %v3910_v23  ;;  %v403_v38 = vrot.slane %v4768_v19, 1  ;;  %v404_v39 = vrot.slane %v4763_v20, 1 }
  0x23   : > { %v4759_v43 = vunpack.c.l.bf16 %v3908_v21  ;;  %v4758_v44 = vunpack.c.h.bf16 %v3908_v21  ;;  %v400_v45 = vsel %vm372_vm1, %v398_v27, %v399_v31  ;;  %v402_v48 = vsel %vm372_vm1, %v399_v31, %v401_v32  ;;  %v3969_v32 = vld [vmem:[%s3781_s28 + $0x6c] sm:$0xff]  }
  0x24   : > { %v406_v49 = vrot.slane %v4760_v35, 1  ;;  %v4754_v52 = vunpack.c.l.bf16 %v3917_v28  ;;  %v3948_v59 = vpack.c.bf16 %v402_v48, %v400_v45  ;;  %v4757_v6 = vunpack.c.l.bf16 %v3944_v53 }
  0x25   : > { %3094 = vmatmul.mubr.msk.bf16.gmra.mrb[4].mxu1 %vm506_vm2, %v3910_v23  ;;  %v408_v61 = vrot.slane %v4759_v43, 1  ;;  %v409_v62 = vrot.slane %v4758_v44, 1  ;;  %v405_v24 = vsel %vm372_vm1, %v403_v38, %v404_v39  ;;  %v4756_v27 = vunpack.c.h.bf16 %v3944_v53  ;;  %v3976_v38 = vld [vmem:[%s3781_s28 + $0x74] sm:$0x1] }
  0x26   : > { %3097 = vmatprep.mubr.msk.bf16.mxu1 %vm506_vm2, %v3919_v30  ;;  %v411_v63 = vrot.slane %v4754_v52, 1  ;;  %v407_v26 = vsel %vm372_vm1, %v404_v39, %v406_v49  ;;  %v4755_v31 = vunpack.c.l.bf16 %v3951_v60  ;;  %v938_v45 = vrot.slane %v256_v15, 2  ;;  %v3987_v52 = vld [vmem:[%s3781_s28 + $0x78] sm:$0xff]   ;;  %v3990_v15 = vld [vmem:[%s3781_s28 + $0x80] sm:$0x1] }
  0x27   : > { %v410_v48 = vsel %vm372_vm1, %v408_v61, %v409_v62  ;;  %v939_v39 = vrot.slane %v257_v17, 2  ;;  %v941_v49 = vrot.slane %v258_v18, 2  ;;  %v3982_v12 = vpack.c.bf16 %v407_v26, %v405_v24 }
  0x28   : > { %3230 = vmatmul.mubr.msk.bf16.gmra.mrb[4].mxu0 %vm506_vm2, %v3919_v30  ;;  %v412_v13 = vsel %vm372_vm1, %v409_v62, %v411_v63  ;;  %v413_v11 = vrot.slane %v4757_v6, 1  ;;  %v414_v61 = vrot.slane %v4756_v27, 1  ;;  %v416_v17 = vrot.slane %v4755_v31, 1 }
  0x29   : > { %3233 = vmatprep.mubr.msk.bf16.mxu0 %vm506_vm2, %v3948_v59  ;;  %v4762_v14 = vunpack.c.l.bf16 %v3969_v32  ;;  %v4761_v18 = vunpack.c.h.bf16 %v3969_v32  ;;  %v4002_v62 = vpack.c.bf16 %v412_v13, %v410_v48  ;;  %v4767_v63 = vunpack.c.l.bf16 %v3976_v38 }
  0x2a   : > { %v943_v24 = vrot.slane %v259_v22, 2  ;;  %v4765_v26 = vunpack.c.l.bf16 %v3987_v52  ;;  %v4764_v31 = vunpack.c.h.bf16 %v3987_v52  ;;  %v4766_v27 = vunpack.c.l.bf16 %v3990_v15 }
  0x2b   : > { %v944_v6 = vrot.slane %v260_v33, 2  ;;  %v946_v44 = vrot.slane %v261_v34, 2  ;;  %v940_v13 = vsel %vm932_vm3, %v938_v45, %v939_v39  ;;  %v942_v48 = vsel %vm932_vm3, %v939_v39, %v941_v49  ;;  %v4025_v33 = vld [vmem:[%s3781_s28 + $0x84] sm:$0xff]   ;;  %v4028_v34 = vld [vmem:[%s3781_s28 + $0x8c] sm:$0x1] }
  0x2c   : > { %v415_v22 = vsel %vm372_vm1, %v413_v11, %v414_v61  ;;  %v417_v43 = vsel %vm372_vm1, %v414_v61, %v416_v17  ;;  %v418_v35 = vrot.slane %v4762_v14, 1  ;;  %v419_v25 = vrot.slane %v4761_v18, 1  ;;  %v4043_v17 = vld [vmem:[%s3781_s28 + $0x90] sm:$0xff]  }
  0x2d   : > { %3098 = vmatmul.mubr.msk.bf16.gmra.mrb[8].mxu1 %vm506_vm2, %v3948_v59  ;;  %v421_v45 = vrot.slane %v4767_v63, 1  ;;  %v4034_v11 = vpack.c.bf16 %v942_v48, %v940_v13  ;;  %v423_v39 = vrot.slane %v4765_v26, 1  ;;  %v424_v49 = vrot.slane %v4764_v31, 1  ;;  %v4051_v48 = vld [vmem:[%s3781_s28 + $0x98] sm:$0x1] }
  0x2e   : > { %3101 = vmatprep.mubr.msk.bf16.mxu1 %vm506_vm2, %v3982_v12  ;;  %v426_v61 = vrot.slane %v4766_v27, 1  ;;  %v4045_v18 = vpack.c.bf16 %v417_v43, %v415_v22  ;;  %v4775_v14 = vunpack.c.l.bf16 %v4025_v33  ;;  %v4774_v20 = vunpack.c.h.bf16 %v4025_v33 }
  0x2f   : > { %v4772_v13 = vunpack.c.l.bf16 %v4028_v34  ;;  %v420_v31 = vsel %vm372_vm1, %v418_v35, %v419_v25  ;;  %v945_v26 = vsel %vm932_vm3, %v943_v24, %v944_v6  ;;  %v947_v27 = vsel %vm932_vm3, %v944_v6, %v946_v44 }
  0x30   : > { %3234 = vmatmul.mubr.msk.bf16.gmra.mrb[8].mxu0 %vm506_vm2, %v3982_v12  ;;  %v948_v43 = vrot.slane %v262_v40, 2  ;;  %v422_v22 = vsel %vm372_vm1, %v419_v25, %v421_v45  ;;  %v949_v63 = vrot.slane %v263_v41, 2  ;;  %v4771_v19 = vunpack.c.l.bf16 %v4043_v17 }
  0x31   : > { %3237 = vmatprep.mubr.msk.bf16.mxu0 %vm506_vm2, %v4002_v62  ;;  %v4770_v7 = vunpack.c.h.bf16 %v4043_v17  ;;  %v425_v35 = vsel %vm372_vm1, %v423_v39, %v424_v49  ;;  %v427_v44 = vsel %vm372_vm1, %v424_v49, %v426_v61  ;;  %v951_v40 = vrot.slane %v264_v47, 2 }
  0x32   : > { %v4773_v6 = vunpack.c.l.bf16 %v4051_v48  ;;  %v428_v24 = vrot.slane %v4775_v14, 1  ;;  %v429_v41 = vrot.slane %v4774_v20, 1  ;;  %v431_v25 = vrot.slane %v4772_v13, 1 }
  0x33   : > { %v4080_v45 = vpack.c.bf16 %v422_v22, %v420_v31  ;;  %v4082_v39 = vpack.c.bf16 %v947_v27, %v945_v26  ;;  %v1940_v36 = vsel %vm555_vm0, %v3897_v5, 0  ;;  %v4088_v47 = vpack.c.bf16 %v427_v44, %v425_v35  ;;  %v4096_v27 = vld [vmem:[%s3781_s28 + $0x9c] sm:$0xff]   ;;  %v4101_v5 = vld [vmem:[%s4747_s1 + $0xc] ss:$0 sps:$4 sm:$0xcc]  }
  0x34   : > { %v950_v49 = vsel %vm932_vm3, %v948_v43, %v949_v63  ;;  %v433_v61 = vrot.slane %v4771_v19, 1  ;;  %v434_v31 = vrot.slane %v4770_v7, 1  ;;  %v952_v26 = vsel %vm932_vm3, %v949_v63, %v951_v40  ;;  %v4111_v44 = vld [vmem:[%s3781_s28 + $0xa4] sm:$0x1]  ;;  %v4120_v40 = vld [vmem:[%s3781_s28 + $0xa8] sm:$0xff]  }
  0x35   : > { %3102 = vmatmul.mubr.msk.bf16.gmra.mrb[12].mxu1 %vm506_vm2, %v4002_v62  ;;  %v953_v22 = vrot.slane %v265_v50, 2  ;;  %v954_v43 = vrot.slane %v266_v54, 2  ;;  %v436_v35 = vrot.slane %v4773_v6, 1  ;;  %v430_v7 = vsel %vm372_vm1, %v428_v24, %v429_v41  ;;  %v4123_v50 = vld [vmem:[%s3781_s28 + $0xb0] sm:$0x1] }
  0x36   : > { %3105 = vmatprep.mubr.msk.bf16.mxu1 %vm506_vm2, %v4045_v18  ;;  %v432_v19 = vsel %vm372_vm1, %v429_v41, %v431_v25  ;;  %v956_v13 = vrot.slane %v267_v55, 2  ;;  %v958_v63 = vrot.slane %v268_v0, 2  ;;  %v959_v54 = vrot.slane %v269_v2, 2 }
  0x37   : > { %v4790_v24 = vunpack.c.l.bf16 %v3871_v56  ;;  %v4780_v41 = vunpack.c.l.bf16 %v4096_v27  ;;  %v4135_v55 = vpack.c.bf16 %v952_v26, %v950_v49  ;;  %v435_v0 = vsel %vm372_vm1, %v433_v61, %v434_v31 }
  0x38   : > { %3238 = vmatmul.mubr.msk.bf16.gmra.mrb[12].mxu0 %vm506_vm2, %v4045_v18  ;;  %v4778_v25 = vunpack.c.l.bf16 %v4111_v44  ;;  %v437_v2 = vsel %vm372_vm1, %v434_v31, %v436_v35  ;;  %v4776_v56 = vunpack.c.l.bf16 %v4120_v40  ;;  %v4779_v14 = vunpack.c.l.bf16 %v4123_v50 }
  0x39   : > { %3259 = vmatprep.mubr.msk.bf16.mxu0 %vm506_vm2, %v4034_v11  ;;  %v961_v6 = vrot.slane %v4790_v24, 2  ;;  %v4777_v24 = vunpack.c.h.bf16 %v4120_v40  ;;  %v4144_v42 = vpack.c.bf16 %v432_v19, %v430_v7  ;;  %v955_v49 = vsel %vm932_vm3, %v953_v22, %v954_v43 }
  0x3a   : > { %v957_v61 = vsel %vm932_vm3, %v954_v43, %v956_v13  ;;  %v960_v26 = vsel %vm932_vm3, %v958_v63, %v959_v54  ;;  %v438_v35 = vrot.slane %v4780_v41, 1  ;;  %v4792_v20 = vunpack.c.h.bf16 %v4096_v27  ;;  %v4174_v63 = vld [vmem:[%s3781_s28 + $0xbc] sm:$0x1] }
  0x3b   : > { %4791 = vst [vmem:[#allocation3_spill] sm:$0xff] %v4144_v42  ;;  %v962_v31 = vsel %vm932_vm3, %v959_v54, %v961_v6  ;;  %v4158_v19 = vpack.c.bf16 %v437_v2, %v435_v0  ;;  %v441_v13 = vrot.slane %v4778_v25, 1  ;;  %v4162_v22 = vpack.c.bf16 %v957_v61, %v955_v49 }
  0x3c   : > { %v439_v7 = vrot.slane %v4792_v20, 1  ;;  %v443_v6 = vrot.slane %v4776_v56, 1  ;;  %v444_v43 = vrot.slane %v4777_v24, 1  ;;  %v446_v20 = vrot.slane %v4779_v14, 1 }
  0x3d   : > { %3106 = vmatmul.mubr.msk.bf16.gmra.mrb[16].mxu1 %vm506_vm2, %v4080_v45  ;;  %v4793_v54 = vrot.slane %v4101_v5, 2  ;;  %v4179_v0 = vpack.c.bf16 %v962_v31, %v960_v26  ;;  %v4794_v2 = vunpack.c.l.bf16 %v3874_v57  ;;  %v4795_v61 = vunpack.c.h.bf16 %v3874_v57 }
  0x3e   : > { %3109 = vmatprep.mubr.msk.bf16.mxu1 %vm506_vm2, %v4088_v47  ;;  %v4796_v24 = vunpack.c.l.bf16 %v3892_v4  ;;  %v440_v14 = vsel %vm372_vm1, %v438_v35, %v439_v7  ;;  %v4797_v41 = vunpack.c.l.bf16 %v3908_v21  ;;  %v4798_v26 = vunpack.c.h.bf16 %v3908_v21 }
  0x3f   : > { %v963_v49 = vrot.slane %v4794_v2, 2  ;;  %v964_v56 = vrot.slane %v4795_v61, 2  ;;  %v442_v4 = vsel %vm372_vm1, %v439_v7, %v441_v13 }
  0x40   : > { %3260 = vmatmul.mubr.msk.bf16.vlgmr.msra.gmra.mrb[0].mxu0 %vm506_vm2, %v4082_v39  ;;  %v966_v25 = vrot.slane %v4796_v24, 2  ;;  %v968_v3 = vrot.slane %v4797_v41, 2  ;;  %v969_v31 = vrot.slane %v4798_v26, 2  ;;  %v447_v41 = vsel %vm372_vm1, %v444_v43, %v446_v20 }
  0x41   : > { %3292 = vmatpush3.bf16.msra.mxu0 %v1940_v36  ;;  %3263 = vmatprep.mubr.msk.bf16.mxu0 %vm506_vm2, %v4135_v55  ;;  %v4171_v36 = vld [vmem:[%s3781_s28 + $0xb4] sm:$0xff]   ;;  %v965_v26 = vsel %vm932_vm3, %v963_v49, %v964_v56 }
  0x42   : > { %3659 = vmatprep.subr.msk.bf16.mxu0 %vm555_vm0, %v4793_v54  ;;  %v4799_v54 = vunpack.c.l.bf16 %v3917_v28  ;;  %v4785_v24 = vunpack.c.l.bf16 %v4171_v36  ;;  %v4784_v61 = vunpack.c.h.bf16 %v4171_v36  ;;  %v4207_v28 = vpack.c.bf16 %v442_v4, %v440_v14 }
  0x43   : > { %v970_v7 = vsel %vm932_vm3, %v968_v3, %v969_v31  ;;  %v4801_v14 = vunpack.c.l.bf16 %v4174_v63 }
  0x44   : > { %v971_v2 = vrot.slane %v4799_v54, 2  ;;  %v967_v54 = vsel %vm932_vm3, %v964_v56, %v966_v25  ;;  %v4802_v56 = vunpack.c.l.bf16 %v3944_v53 }
  0x45   : > { %3110 = vmatmul.mubr.msk.bf16.gmra.mrb[20].mxu1 %vm506_vm2, %v4144_v42  ;;  %v445_v42 = vsel %vm372_vm1, %v443_v6, %v444_v43  ;;  %v448_v6 = vrot.slane %v4785_v24, 1  ;;  %v449_v43 = vrot.slane %v4784_v61, 1  ;;  %v451_v20 = vrot.slane %v4801_v14, 1 }
  0x46   : > { %3113 = vmatprep.mubr.msk.bf16.mxu1 %vm506_vm2, %v4158_v19  ;;  %v972_v13 = vsel %vm932_vm3, %v969_v31, %v971_v2  ;;  %v4214_v35 = vpack.c.bf16 %v447_v41, %v445_v42  ;;  %v4224_v3 = vpack.c.bf16 %v967_v54, %v965_v26  ;;  %v973_v42 = vrot.slane %v4802_v56, 2 }
  0x47   : > { %v4226_v25 = vpack.c.bf16 %v972_v13, %v970_v7  ;;  %v450_v49 = vsel %vm372_vm1, %v448_v6, %v449_v43  ;;  %v452_v31 = vsel %vm372_vm1, %v449_v43, %v451_v20  ;;  %v4803_v2 = vunpack.c.h.bf16 %v3944_v53 }
  0x48   : > { %3264 = vmatmul.mubr.msk.bf16.gmra.mrb[4].mxu0 %vm506_vm2, %v4162_v22  ;;  %4800 = vst [vmem:[#allocation4_spill] sm:$0xff] %v4214_v35  ;;  %v4804_v41 = vunpack.c.l.bf16 %v3951_v60  ;;  %v4805_v26 = vunpack.c.l.bf16 %v3969_v32  ;;  %v4806_v7 = vunpack.c.h.bf16 %v3969_v32  ;;  %v4807_v56 = vunpack.c.l.bf16 %v3976_v38 }
  0x49   : > { %3267 = vmatprep.mubr.msk.bf16.mxu0 %vm506_vm2, %v4179_v0  ;;  %v974_v4 = vrot.slane %v4803_v2, 2  ;;  %v4808_v24 = vunpack.c.l.bf16 %v3785_v8  ;;  %v4809_v43 = vunpack.c.h.bf16 %v3785_v8  ;;  %v4810_v2 = vunpack.c.l.bf16 %v3788_v9 }
  0x4a   : > { %v976_v14 = vrot.slane %v4804_v41, 2  ;;  %v978_v54 = vrot.slane %v4805_v26, 2  ;;  %v979_v13 = vrot.slane %v4806_v7, 2  ;;  %v981_v61 = vrot.slane %v4807_v56, 2 }
  0x4b   : > { %v933_v6 = vrot.slane %v4808_v24, 2  ;;  %v934_v20 = vrot.slane %v4809_v43, 2  ;;  %v4252_v60 = vpack.c.bf16 %v452_v31, %v450_v49  ;;  %v975_v38 = vsel %vm932_vm3, %v973_v42, %v974_v4 }
  0x4c   : > { %v977_v41 = vsel %vm932_vm3, %v974_v4, %v976_v14  ;;  %v980_v24 = vsel %vm932_vm3, %v978_v54, %v979_v13  ;;  %v982_v26 = vsel %vm932_vm3, %v979_v13, %v981_v61  ;;  %v4811_v7 = vunpack.c.l.bf16 %v3987_v52 }
  0x4d   : > { %3114 = vmatmul.mubr.msk.bf16.gmra.mrb[24].mxu1 %vm506_vm2, %v4207_v28  ;;  %v4262_v9 = vpack.c.bf16 %v977_v41, %v975_v38  ;;  %v4267_v31 = vsel %vm932_vm3, %v933_v6, %v934_v20  ;;  %v4274_v42 = vpack.c.bf16 %v982_v26, %v980_v24  ;;  %v4812_v61 = vunpack.c.h.bf16 %v3987_v52  ;;  %v4291_v38 = vld [vmem:[%s4747_s1 + $0x4] ss:$0 sps:$4 sm:$0xcc]  }
  0x4e   : > { %3117 = vmatprep.mubr.msk.bf16.mxu1 %vm506_vm2, %v4214_v35  ;;  %v936_v35 = vrot.slane %v4810_v2, 2  ;;  %v983_v49 = vrot.slane %v4811_v7, 2  ;;  %v4813_v14 = vunpack.c.l.bf16 %v3990_v15  ;;  %v4814_v6 = vunpack.c.l.bf16 %v4025_v33 }
  0x4f   : > { %v984_v4 = vrot.slane %v4812_v61, 2  ;;  %v4816_v2 = vunpack.c.l.bf16 %v4028_v34  ;;  %v1111_v24 = vsel %vm555_vm0, %v3853_v46, 0  ;;  %v4788_v7 = vrot.slane %v4291_v38, 2 }
  0x50   : > { %3268 = vmatmul.mubr.msk.bf16.gmra.mrb[8].mxu0 %vm506_vm2, %v4224_v3  ;;  %v4270_v56 = vsel %vm932_vm3, %v934_v20, %v936_v35  ;;  %v986_v54 = vrot.slane %v4813_v14, 2  ;;  %v988_v43 = vrot.slane %v4814_v6, 2  ;;  %v4815_v35 = vunpack.c.h.bf16 %v4025_v33 }
  0x51   : > { %3271 = vmatprep.mubr.msk.bf16.mxu0 %vm506_vm2, %v4226_v25  ;;  %v1045_v13 = vpack.c.bf16 %v4270_v56, %v4267_v31  ;;  %v985_v15 = vsel %vm932_vm3, %v983_v49, %v984_v4  ;;  %v4818_v14 = vunpack.c.h.bf16 %v4043_v17  ;;  %v4819_v6 = vunpack.c.l.bf16 %v4051_v48  ;;  %v252_v56 = vld [vmem:[%s3781_s28 + $0xd4] sm:$0x1] }
  0x52   : > { %v989_v20 = vrot.slane %v4815_v35, 2  ;;  %v987_v41 = vsel %vm932_vm3, %v984_v4, %v986_v54  ;;  %v4817_v4 = vunpack.c.l.bf16 %v4043_v17  ;;  %v4820_v35 = vunpack.c.l.bf16 %v4096_v27 }
  0x53   : > { %v4306_v61 = vpack.c.bf16 %v987_v41, %v985_v15  ;;  %v994_v54 = vrot.slane %v4818_v14, 2  ;;  %v4822_v15 = vunpack.c.l.bf16 %v4111_v44 }
  0x54   : > { %v990_v34 = vsel %vm932_vm3, %v988_v43, %v989_v20  ;;  %v993_v46 = vrot.slane %v4817_v4, 2  ;;  %v996_v43 = vrot.slane %v4819_v6, 2  ;;  %v4823_v4 = vunpack.c.l.bf16 %v4120_v40 }
  0x55   : > { %3118 = vmatmul.mubr.msk.bf16.gmra.mrb[28].mxu1 %vm506_vm2, %v4252_v60  ;;  %v1001_v41 = vrot.slane %v4822_v15, 2  ;;  %v4824_v6 = vunpack.c.h.bf16 %v4120_v40 }
  0x56   : > { %3123 = vmatprep.mubr.msk.bf16.mxu1 %vm506_vm2, %v3785_v8  ;;  %v991_v8 = vrot.slane %v4816_v2, 2  ;;  %v4821_v2 = vunpack.c.h.bf16 %v4096_v27  ;;  %v995_v48 = vsel %vm932_vm3, %v993_v46, %v994_v54  ;;  %v1003_v14 = vrot.slane %v4823_v4, 2  ;;  %v249_v4 = vld [vmem:[%s3781_s28 + $0xc8] sm:$0x1] }
  0x58   : > { %3272 = vmatmul.mubr.msk.bf16.gmra.mrb[12].mxu0 %vm506_vm2, %v4262_v9  ;;  %v992_v26 = vsel %vm932_vm3, %v989_v20, %v991_v8  ;;  %v998_v20 = vrot.slane %v4820_v35, 2  ;;  %v999_v8 = vrot.slane %v4821_v2, 2  ;;  %v1004_v35 = vrot.slane %v4824_v6, 2 }
  0x59   : > { %3275 = vmatprep.mubr.msk.bf16.mxu0 %vm506_vm2, %v4274_v42  ;;  %v4310_v49 = vpack.c.bf16 %v992_v26, %v990_v34 }
  0x5a   : > { %v1000_v34 = vsel %vm932_vm3, %v998_v20, %v999_v8  ;;  %v1002_v44 = vsel %vm932_vm3, %v999_v8, %v1001_v41  ;;  %v4826_v20 = vunpack.c.l.bf16 %v4171_v36  ;;  %v4827_v8 = vunpack.c.h.bf16 %v4171_v36 }
  0x5b   : > { %v4345_v46 = vpack.c.bf16 %v1002_v44, %v1000_v34  ;;  %v4828_v41 = vunpack.c.l.bf16 %v4174_v63  ;;  %v1005_v34 = vsel %vm932_vm3, %v1003_v14, %v1004_v35 }
  0x5c   : > { %v1008_v2 = vrot.slane %v4826_v20, 2  ;;  %v1009_v15 = vrot.slane %v4827_v8, 2 }
  0x5d   : > { %3124 = vmatmul.mubr.msk.bf16.vlgmr.msra.gmra.mrb[0].mxu1 %vm506_vm2, %v3791_v10 }
  0x5e   : > { %3156 = vmatpush3.bf16.msra.mxu1 %v1111_v24  ;;  %3127 = vmatprep.mubr.msk.bf16.mxu1 %vm506_vm2, %v3801_v16  ;;  %v997_v24 = vsel %vm932_vm3, %v994_v54, %v996_v43  ;;  %v4825_v54 = vunpack.c.l.bf16 %v4123_v50  ;;  %v1010_v63 = vsel %vm932_vm3, %v1008_v2, %v1009_v15 }
  0x5f   : > { %3654 = vmatprep.subr.msk.bf16.mxu1 %vm555_vm0, %v4788_v7  ;;  %v4337_v26 = vpack.c.bf16 %v997_v24, %v995_v48  ;;  %v1011_v48 = vrot.slane %v4828_v41, 2  ;;  %v4356_v24 = vld [vmem:[%s3781_s28 + $0xc0] sm:$0xff]  }
  0x60   : > { %3276 = vmatmul.mubr.msk.bf16.gmra.mrb[16].mxu0 %vm506_vm2, %v4306_v61  ;;  %v1006_v43 = vrot.slane %v4825_v54, 2  ;;  %v301_v44 = vunpack.c.l.bf16 %v4356_v24  ;;  %v302_v6 = vunpack.c.h.bf16 %v4356_v24  ;;  %v303_v54 = vunpack.c.l.bf16 %v249_v4 }
  0x61   : > { %3279 = vmatprep.mubr.msk.bf16.mxu0 %vm506_vm2, %v4310_v49  ;;  %v1012_v20 = vsel %vm932_vm3, %v1009_v15, %v1011_v48 }
  0x62   : > { %v1007_v50 = vsel %vm932_vm3, %v1004_v35, %v1006_v43  ;;  %v4375_v14 = vpack.c.bf16 %v1012_v20, %v1010_v63  ;;  %v1722_v35 = vrot.slane %v301_v44, 2  ;;  %v1723_v43 = vrot.slane %v302_v6, 2 }
  0x63   : > { %v4371_v8 = vpack.c.bf16 %v1007_v50, %v1005_v34  ;;  %v1725_v41 = vrot.slane %v303_v54, 2  ;;  %v1514_v4 = vrot.slane %v301_v44, 1  ;;  %v1515_v2 = vrot.slane %v302_v6, 1  ;;  %v2358_v6 = vld [vmem:[%s4747_s1 + $0x10] sm:$0x3] }
  0x64   : > { %v1517_v7 = vrot.slane %v303_v54, 1  ;;  %v1724_v15 = vsel %vm932_vm3, %v1722_v35, %v1723_v43  ;;  %v306_v35 = vunpack.c.l.bf16 %v252_v56 }
  0x65   : > { %3128 = vmatmul.mubr.msk.bf16.gmra.mrb[4].mxu1 %vm506_vm2, %v3824_v29  ;;  %v1726_v48 = vsel %vm932_vm3, %v1723_v43, %v1725_v41  ;;  %v1516_v34 = vsel %vm372_vm1, %v1514_v4, %v1515_v2 }
  0x66   : > { %3131 = vmatprep.mubr.msk.bf16.mxu1 %vm506_vm2, %v3836_v37  ;;  %v1518_v50 = vsel %vm372_vm1, %v1515_v2, %v1517_v7  ;;  %v4389_v20 = vpack.c.bf16 %v1726_v48, %v1724_v15  ;;  %v4829_v7 = vrot.slane %v4101_v5, 2  ;;  %v4830_v5 = vrot.slane %v4291_v38, 2 }
  0x67   : > { %v4385_v63 = vpack.c.bf16 %v1518_v50, %v1516_v34  ;;  %v2353_v43 = vrot.slane %v306_v35, 2  ;;  %v2363_v15 = vsel %vm555_vm0, %v2358_v6, 0 }
  0x68   : > { %3280 = vmatmul.mubr.msk.bf16.gmra.mrb[20].mxu0 %vm506_vm2, %v4337_v26  ;;  %v2155_v44 = vsel %vm555_vm0, %v4829_v7, 0  ;;  %v1316_v54 = vsel %vm555_vm0, %v4830_v5, 0 }
  0x69   : > { %3283 = vmatprep.mubr.msk.bf16.mxu0 %vm506_vm2, %v4345_v46 }
  0x6d   : > { %3132 = vmatmul.mubr.msk.bf16.gmra.mrb[8].mxu1 %vm506_vm2, %v3864_v51 }
  0x6e   : > { %3135 = vmatprep.mubr.msk.bf16.mxu1 %vm506_vm2, %v3874_v57 }
  0x70   : > { %3284 = vmatmul.mubr.msk.bf16.gmra.mrb[24].mxu0 %vm506_vm2, %v4371_v8 }
  0x71   : > { %3287 = vmatprep.mubr.msk.bf16.mxu0 %vm506_vm2, %v4375_v14 }
  0x75   : > { %3136 = vmatmul.mubr.msk.bf16.gmra.mrb[12].mxu1 %vm506_vm2, %v3908_v21 }
  0x76   : > { %3139 = vmatprep.mubr.msk.bf16.mxu1 %vm506_vm2, %v3944_v53 }
  0x78   : > { %3288 = vmatmul.mubr.msk.bf16.gmra.mrb[28].mxu0 %vm506_vm2, %v4389_v20 }
  0x79   : > { %3293 = vmatprep.mubr.msk.bf16.mxu0 %vm506_vm2, %v3801_v16 }
  0x7d   : > { %3140 = vmatmul.mubr.msk.bf16.gmra.mrb[16].mxu1 %vm506_vm2, %v3969_v32 }
  0x7e   : > { %3143 = vmatprep.mubr.msk.bf16.mxu1 %vm506_vm2, %v3987_v52 }
  0x80   : > { %3294 = vmatmul.mubr.msk.bf16.vlgmr.msra.gmra.mrb[0].mxu0 %vm506_vm2, %v3824_v29 }
  0x81   : > { %3326 = vmatpush3.bf16.msra.mxu0 %v2155_v44  ;;  %3297 = vmatprep.mubr.msk.bf16.mxu0 %vm506_vm2, %v3836_v37 }
  0x82   : > { %3660 = vmatprep.subr.msk.bf16.mxu0 %vm555_vm0, %v2358_v6 }
  0x85   : > { %3144 = vmatmul.mubr.msk.bf16.gmra.mrb[20].mxu1 %vm506_vm2, %v4025_v33 }
  0x86   : > { %3147 = vmatprep.mubr.msk.bf16.mxu1 %vm506_vm2, %v4043_v17 }
  0x88   : > { %3298 = vmatmul.mubr.msk.bf16.gmra.mrb[4].mxu0 %vm506_vm2, %v3864_v51 }
  0x89   : > { %3301 = vmatprep.mubr.msk.bf16.mxu0 %vm506_vm2, %v3874_v57 }
  0x8d   : > { %3148 = vmatmul.mubr.msk.bf16.gmra.mrb[24].mxu1 %vm506_vm2, %v4096_v27 }
  0x8e   : > { %3151 = vmatprep.mubr.msk.bf16.mxu1 %vm506_vm2, %v4120_v40 }
  0x90   : > { %3302 = vmatmul.mubr.msk.bf16.gmra.mrb[8].mxu0 %vm506_vm2, %v3908_v21 }
  0x91   : > { %3305 = vmatprep.mubr.msk.bf16.mxu0 %vm506_vm2, %v3944_v53 }
  0x95   : > { %3152 = vmatmul.mubr.msk.bf16.gmra.mrb[28].mxu1 %vm506_vm2, %v4171_v36 }
  0x96   : > { %3157 = vmatprep.mubr.msk.bf16.mxu1 %vm506_vm2, %v1045_v13 }
  0x98   : > { %3306 = vmatmul.mubr.msk.bf16.gmra.mrb[12].mxu0 %vm506_vm2, %v3969_v32 }
  0x99   : > { %3309 = vmatprep.mubr.msk.bf16.mxu0 %vm506_vm2, %v3987_v52 }
  0x9d   : > { %3158 = vmatmul.mubr.msk.bf16.vlgmr.msra.gmra.mrb[0].mxu1 %vm506_vm2, %v4034_v11 }
  0x9e   : > { %3190 = vmatpush3.bf16.msra.mxu1 %v1316_v54  ;;  %3161 = vmatprep.mubr.msk.bf16.mxu1 %vm506_vm2, %v4082_v39 }
  0x9f   : > { %3656 = vmatprep.subr.msk.bf16.mxu1 %vm555_vm0, %v3757_v1  ;;  %v250_v1 = vld [vmem:[%s3781_s28 + $0xcc] sm:$0xff]  }
  0xa0   : > { %3310 = vmatmul.mubr.msk.bf16.gmra.mrb[16].mxu0 %vm506_vm2, %v4025_v33  ;;  %v304_v11 = vunpack.c.l.bf16 %v250_v1  ;;  %v305_v31 = vunpack.c.h.bf16 %v250_v1 }
  0xa1   : > { %3313 = vmatprep.mubr.msk.bf16.mxu0 %vm506_vm2, %v4043_v17 }
  0xa2   : > { %v2350_v13 = vrot.slane %v304_v11, 2  ;;  %v2351_v38 = vrot.slane %v305_v31, 2 }
  0xa4   : > { %v4472_v41 = vsel %vm932_vm3, %v2350_v13, %v2351_v38  ;;  %v4477_v4 = vsel %vm932_vm3, %v2351_v38, %v2353_v43 }
  0xa5   : > { %3162 = vmatmul.mubr.msk.bf16.gmra.mrb[4].mxu1 %vm506_vm2, %v4135_v55  ;;  %v2357_v2 = vpack.c.bf16 %v4477_v4, %v4472_v41 }
  0xa6   : > { %3165 = vmatprep.mubr.msk.bf16.mxu1 %vm506_vm2, %v4162_v22 }
  0xa8   : > { %3314 = vmatmul.mubr.msk.bf16.gmra.mrb[20].mxu0 %vm506_vm2, %v4096_v27 }
  0xa9   : > { %3317 = vmatprep.mubr.msk.bf16.mxu0 %vm506_vm2, %v4120_v40 }
  0xad   : > { %3166 = vmatmul.mubr.msk.bf16.gmra.mrb[8].mxu1 %vm506_vm2, %v4179_v0 }
  0xae   : > { %3169 = vmatprep.mubr.msk.bf16.mxu1 %vm506_vm2, %v4224_v3 }
  0xb0   : > { %3318 = vmatmul.mubr.msk.bf16.gmra.mrb[24].mxu0 %vm506_vm2, %v4171_v36 }
  0xb1   : > { %3321 = vmatprep.mubr.msk.bf16.mxu0 %vm506_vm2, %v4356_v24 }
  0xb5   : > { %3170 = vmatmul.mubr.msk.bf16.gmra.mrb[12].mxu1 %vm506_vm2, %v4226_v25 }
  0xb6   : > { %3173 = vmatprep.mubr.msk.bf16.mxu1 %vm506_vm2, %v4262_v9 }
  0xb8   : > { %3322 = vmatmul.mubr.msk.bf16.gmra.mrb[28].mxu0 %vm506_vm2, %v250_v1 }
  0xb9   : > { %3327 = vmatprep.mubr.msk.bf16.mxu0 %vm506_vm2, %v3876_v58  ;;  %v4832_v58 = vld [vmem:[#allocation3_spill] sm:$0xff] }
  0xbd   : > { %3174 = vmatmul.mubr.msk.bf16.gmra.mrb[16].mxu1 %vm506_vm2, %v4274_v42 }
  0xbe   : > { %3177 = vmatprep.mubr.msk.bf16.mxu1 %vm506_vm2, %v4306_v61 }
  0xc0   : > { %3328 = vmatmul.mubr.msk.bf16.vlgmr.msra.gmra.mrb[0].mxu0 %vm506_vm2, %v3910_v23  ;;  %v2141_v23 = vrot.slane %v306_v35, 1 }
  0xc1   : > { %3360 = vmatpush3.bf16.msra.mxu0 %v2363_v15  ;;  %3331 = vmatprep.mubr.msk.bf16.mxu0 %vm506_vm2, %v3919_v30 }
  0xc5   : > { %3178 = vmatmul.mubr.msk.bf16.gmra.mrb[20].mxu1 %vm506_vm2, %v4310_v49 }
  0xc6   : > { %3181 = vmatprep.mubr.msk.bf16.mxu1 %vm506_vm2, %v4337_v26 }
  0xc8   : > { %3332 = vmatmul.mubr.msk.bf16.gmra.mrb[4].mxu0 %vm506_vm2, %v3948_v59 }
  0xc9   : > { %3335 = vmatprep.mubr.msk.bf16.mxu0 %vm506_vm2, %v3982_v12  ;;  %v4831_v12 = vld [vmem:[#allocation2_spill] sm:$0xff] }
  0xcd   : > { %3182 = vmatmul.mubr.msk.bf16.gmra.mrb[24].mxu1 %vm506_vm2, %v4345_v46 }
  0xce   : > { %3185 = vmatprep.mubr.msk.bf16.mxu1 %vm506_vm2, %v4371_v8 }
  0xd0   : > { %3336 = vmatmul.mubr.msk.bf16.gmra.mrb[8].mxu0 %vm506_vm2, %v4002_v62 }
  0xd1   : > { %3339 = vmatprep.mubr.msk.bf16.mxu0 %vm506_vm2, %v4045_v18 }
  0xd5   : > { %3186 = vmatmul.mubr.msk.bf16.gmra.mrb[28].mxu1 %vm506_vm2, %v4375_v14 }
  0xd6   : > { %3191 = vmatprep.mubr.msk.bf16.mxu1 %vm506_vm2, %v3791_v10  ;;  %v4833_v10 = vld [vmem:[#allocation4_spill] sm:$0xff] }
  0xd8   : > { %3340 = vmatmul.mubr.msk.bf16.gmra.mrb[12].mxu0 %vm506_vm2, %v4080_v45 }
  0xd9   : > { %3343 = vmatprep.mubr.msk.bf16.mxu0 %vm506_vm2, %v4088_v47 }
  0xdd   : > { %3192 = vmatmul.mubr.msk.bf16.vlgmr.msra.gmra.mrb[0].mxu1 %vm506_vm2, %v3801_v16  ;;  %v2138_v16 = vrot.slane %v304_v11, 1 }
  0xde   : > { %3394 = vmatpush3.bf16.msra.mxu1 %v4831_v12  ;;  %3195 = vmatprep.mubr.msk.bf16.mxu1 %vm506_vm2, %v3824_v29  ;;  %v2139_v29 = vrot.slane %v305_v31, 1 }
  0xe0   : > { %3344 = vmatmul.mubr.msk.bf16.gmra.mrb[16].mxu0 %vm506_vm2, %v4832_v58 }
  0xe1   : > { %3347 = vmatprep.mubr.msk.bf16.mxu0 %vm506_vm2, %v4158_v19 }
  0xe5   : > { %3196 = vmatmul.mubr.msk.bf16.gmra.mrb[4].mxu1 %vm506_vm2, %v3836_v37  ;;  %v2140_v37 = vsel %vm372_vm1, %v2138_v16, %v2139_v29 }
  0xe6   : > { %3199 = vmatprep.mubr.msk.bf16.mxu1 %vm506_vm2, %v3864_v51  ;;  %v2142_v51 = vsel %vm372_vm1, %v2139_v29, %v2141_v23 }
  0xe8   : > { %3348 = vmatmul.mubr.msk.bf16.gmra.mrb[20].mxu0 %vm506_vm2, %v4207_v28 }
  0xe9   : > { %3351 = vmatprep.mubr.msk.bf16.mxu0 %vm506_vm2, %v4833_v10 }
  0xed   : > { %3200 = vmatmul.mubr.msk.bf16.gmra.mrb[8].mxu1 %vm506_vm2, %v3874_v57  ;;  %v2145_v57 = vpack.c.bf16 %v2142_v51, %v2140_v37 }
  0xee   : > { %3203 = vmatprep.mubr.msk.bf16.mxu1 %vm506_vm2, %v3908_v21 }
  0xf0   : > { %3352 = vmatmul.mubr.msk.bf16.gmra.mrb[24].mxu0 %vm506_vm2, %v4252_v60 }
  0xf1   : > { %3355 = vmatprep.mubr.msk.bf16.mxu0 %vm506_vm2, %v4385_v63 }
  0xf5   : > { %3204 = vmatmul.mubr.msk.bf16.gmra.mrb[12].mxu1 %vm506_vm2, %v3944_v53 }
  0xf6   : > { %3207 = vmatprep.mubr.msk.bf16.mxu1 %vm506_vm2, %v3969_v32 }
  0xf8   : > { %3356 = vmatmul.mubr.msk.bf16.gmra.mrb[28].mxu0 %vm506_vm2, %v2145_v57 }
  0xf9   : > { %3361 = vmatprep.mubr.msk.bf16.mxu0 %vm506_vm2, %v4082_v39 }
  0xfd   : > { %3208 = vmatmul.mubr.msk.bf16.gmra.mrb[16].mxu1 %vm506_vm2, %v3987_v52 }
  0xfe   : > { %3211 = vmatprep.mubr.msk.bf16.mxu1 %vm506_vm2, %v4025_v33 }
 0x100   : > { %3362 = vmatmul.mubr.msk.bf16.vlgmr.msra.gmra.mrb[0].mxu0 %vm506_vm2, %v4135_v55 }
 0x101   : > { %3365 = vmatprep.mubr.msk.bf16.mxu0 %vm506_vm2, %v4162_v22  ;;  %v4628_v22 = vld [vmem:[%s4748_s2] ss:$0 sm:$0xff] }
 0x105   : > { %3212 = vmatmul.mubr.msk.bf16.gmra.mrb[20].mxu1 %vm506_vm2, %v4043_v17 }
 0x106   : > { %3215 = vmatprep.mubr.msk.bf16.mxu1 %vm506_vm2, %v4096_v27 }
 0x108   : > { %3366 = vmatmul.mubr.msk.bf16.gmra.mrb[4].mxu0 %vm506_vm2, %v4179_v0 }
 0x109   : > { %3369 = vmatprep.mubr.msk.bf16.mxu0 %vm506_vm2, %v4224_v3 }
 0x10d   : > { %3216 = vmatmul.mubr.msk.bf16.gmra.mrb[24].mxu1 %vm506_vm2, %v4120_v40 }
 0x10e   : > { %3219 = vmatprep.mubr.msk.bf16.mxu1 %vm506_vm2, %v4171_v36 }
 0x110   : > { %3370 = vmatmul.mubr.msk.bf16.gmra.mrb[8].mxu0 %vm506_vm2, %v4226_v25 }
 0x111   : > { %3373 = vmatprep.mubr.msk.bf16.mxu0 %vm506_vm2, %v4262_v9 }
 0x115   : > { %3220 = vmatmul.mubr.msk.bf16.gmra.mrb[28].mxu1 %vm506_vm2, %v4356_v24 }
 0x116   : > { %3241 = vmatprep.mubr.msk.bf16.mxu1 %vm506_vm2, %v4080_v45 }
 0x118   : > { %3374 = vmatmul.mubr.msk.bf16.gmra.mrb[12].mxu0 %vm506_vm2, %v4274_v42 }
 0x119   : > { %3377 = vmatprep.mubr.msk.bf16.mxu0 %vm506_vm2, %v4306_v61 }
 0x11d   : > { %3242 = vmatmul.mubr.msk.bf16.vlgmr.msra.gmra.mrb[16].mxu1 %vm506_vm2, %v4088_v47 }
 0x11e   : > { %3245 = vmatprep.mubr.msk.bf16.mxu1 %vm506_vm2, %v4832_v58 }
 0x120   : > { %3378 = vmatmul.mubr.msk.bf16.gmra.mrb[16].mxu0 %vm506_vm2, %v4310_v49 }
 0x121   : > { %3381 = vmatprep.mubr.msk.bf16.mxu0 %vm506_vm2, %v4337_v26 }
 0x125   : > { %3246 = vmatmul.mubr.msk.bf16.gmra.mrb[20].mxu1 %vm506_vm2, %v4158_v19 }
 0x126   : > { %3249 = vmatprep.mubr.msk.bf16.mxu1 %vm506_vm2, %v4207_v28  ;;  %v4633_v28 = vld [vmem:[%s4749_s3] ss:$0 sm:$0xff] }
 0x128   : > { %3382 = vmatmul.mubr.msk.bf16.gmra.mrb[20].mxu0 %vm506_vm2, %v4345_v46 }
 0x129   : > { %3385 = vmatprep.mubr.msk.bf16.mxu0 %vm506_vm2, %v4371_v8 }
 0x12d   : > { %3250 = vmatmul.mubr.msk.bf16.gmra.mrb[24].mxu1 %vm506_vm2, %v4833_v10 }
 0x12e   : > { %3253 = vmatprep.mubr.msk.bf16.mxu1 %vm506_vm2, %v4252_v60 }
 0x130   : > { %3386 = vmatmul.mubr.msk.bf16.gmra.mrb[24].mxu0 %vm506_vm2, %v4375_v14 }
 0x131   : > { %3389 = vmatprep.mubr.msk.bf16.mxu0 %vm506_vm2, %v4389_v20 }
 0x135   : > { %3254 = vmatmul.mubr.msk.bf16.gmra.mrb[28].mxu1 %vm506_vm2, %v4385_v63 }
 0x138   : > { %3390 = vmatmul.mubr.msk.bf16.gmra.mrb[28].mxu0 %vm506_vm2, %v2357_v2 }
 0x1b0   : > { %v3193_v21 = vpop.f32.mrb[0].mxu1 }
 0x1b1   : > { %v1352_v30 = vpop.f32.mrb[1].mxu1 }
 0x1b2   : > { %v3194_v52 = vpop.f32.mrb[2].mxu1 }
 0x1b3   : > { %v1355_v53 = vpop.f32.mrb[3].mxu1 }
 0x1b8   : > { %v3197_v59 = vpop.f32.mrb[4].mxu1 }
 0x1b9   : > { %v1368_v32 = vpop.f32.mrb[5].mxu1 }
 0x1ba   : > { %v3198_v18 = vpop.f32.mrb[6].mxu1 }
 0x1bb   : > { %v1371_v62 = vpop.f32.mrb[7].mxu1 }
 0x1c0   : > { %v3201_v33 = vpop.f32.mrb[8].mxu1 }
 0x1c1   : > { %v1384_v17 = vpop.f32.mrb[9].mxu1 }
 0x1c2   : > { %v4613_v45 = vpop.f32.mrb[10].mxu1 }
 0x1c3   : > { %v4615_v39 = vpop.f32.mrb[11].mxu1 }
 0x1c8   : > { %v4617_v47 = vpop.f32.mrb[12].mxu1 }
 0x1c9   : > { %v4619_v27 = vpop.f32.mrb[13].mxu1 }
 0x1ca   : > { %v4621_v40 = vpop.f32.mrb[14].mxu1 }
 0x1cb   : > { %v4623_v55 = vpop.f32.mrb[15].mxu1 }
 0x1d3   : > { %v3363_v19 = vpop.f32.mrb[0].mxu0 }
 0x1d4   : > { %v3395_v36 = vadd.f32 %v3363_v19, %v3193_v21  ;;  %v2399_v0 = vpop.f32.mrb[1].mxu0 }
 0x1d5   : > { %v3396_v3 = vadd.f32 %v2399_v0, %v1352_v30  ;;  %v3364_v25 = vpop.f32.mrb[2].mxu0 }
 0x1d6   : > { %v2567_v60 = vmul.f32 %v3395_v36, %v4628_v22  ;;  %v3397_v9 = vadd.f32 %v3364_v25, %v3194_v52  ;;  %v2402_v42 = vpop.f32.mrb[3].mxu0 }
 0x1d7   : > { %v2565_v61 = vmul.f32 %v3396_v3, %v4628_v22  ;;  %v3398_v49 = vadd.f32 %v2402_v42, %v1355_v53 }
 0x1d8   : > { %v2606_v26 = vadd.f32 %v4633_v28, %v2567_v60  ;;  %v2568_v46 = vmul.f32 %v3397_v9, %v4628_v22 }
 0x1d9   : > { %v2604_v24 = vadd.f32 %v4633_v28, %v2565_v61  ;;  %v2566_v8 = vmul.f32 %v3398_v49, %v4628_v22 }
 0x1da   : > { %v2638_v14 = vmax.f32 %v2606_v26, 0.0  ;;  %v2607_v48 = vadd.f32 %v4633_v28, %v2568_v46 }
 0x1db   : > { %v2636_v34 = vmax.f32 %v2604_v24, 0.0  ;;  %v2605_v50 = vadd.f32 %v4633_v28, %v2566_v8  ;;  %v3367_v63 = vpop.f32.mrb[4].mxu0 }
 0x1dc   : > { %2670 = vst [vmem:[%s4643_s22 + $0x10] sm:$0xff] %v2638_v14  ;;  %v2639_v20 = vmax.f32 %v2607_v48, 0.0  ;;  %v3399_v7 = vadd.f32 %v3367_v63, %v3197_v59  ;;  %v2415_v44 = vpop.f32.mrb[5].mxu0 }
 0x1dd   : > { %2668 = vst [vmem:[%s4643_s22] sm:$0xff] %v2636_v34  ;;  %v2637_v6 = vmax.f32 %v2605_v50, 0.0  ;;  %v3400_v5 = vadd.f32 %v2415_v44, %v1368_v32  ;;  %v3368_v54 = vpop.f32.mrb[6].mxu0 }
 0x1de   : > { %2671 = vst [vmem:[%s4643_s22 + $0x18] sm:$0xff] %v2639_v20  ;;  %v2571_v1 = vmul.f32 %v3399_v7, %v4628_v22  ;;  %v3401_v11 = vadd.f32 %v3368_v54, %v3198_v18  ;;  %v2418_v31 = vpop.f32.mrb[7].mxu0 }
 0x1df   : > { %2669 = vst [vmem:[%s4643_s22 + $0x8] sm:$0xff] %v2637_v6  ;;  %v2569_v56 = vmul.f32 %v3400_v5, %v4628_v22  ;;  %v3402_v13 = vadd.f32 %v2418_v31, %v1371_v62 }
 0x1e0   : > { %v2610_v38 = vadd.f32 %v4633_v28, %v2571_v1  ;;  %v2572_v35 = vmul.f32 %v3401_v11, %v4628_v22 }
 0x1e1   : > { %v2608_v43 = vadd.f32 %v4633_v28, %v2569_v56  ;;  %v2570_v41 = vmul.f32 %v3402_v13, %v4628_v22 }
 0x1e2   : > { %v2642_v4 = vmax.f32 %v2610_v38, 0.0  ;;  %v2611_v2 = vadd.f32 %v4633_v28, %v2572_v35 }
 0x1e3   : > { %v2640_v15 = vmax.f32 %v2608_v43, 0.0  ;;  %v2609_v12 = vadd.f32 %v4633_v28, %v2570_v41  ;;  %v3371_v58 = vpop.f32.mrb[8].mxu0 }
 0x1e4   : > { %2674 = vst [vmem:[%s4643_s22 + $0x30] sm:$0xff] %v2642_v4  ;;  %v2643_v10 = vmax.f32 %v2611_v2, 0.0  ;;  %v3403_v16 = vadd.f32 %v3371_v58, %v3201_v33  ;;  %v2431_v29 = vpop.f32.mrb[9].mxu0 }
 0x1e5   : > { %2672 = vst [vmem:[%s4643_s22 + $0x20] sm:$0xff] %v2640_v15  ;;  %v2641_v23 = vmax.f32 %v2609_v12, 0.0  ;;  %v3404_v37 = vadd.f32 %v2431_v29, %v1384_v17  ;;  %v3372_v51 = vpop.f32.mrb[10].mxu0 }
 0x1e6   : > { %2675 = vst [vmem:[%s4643_s22 + $0x38] sm:$0xff] %v2643_v10  ;;  %v2575_v57 = vmul.f32 %v3403_v16, %v4628_v22  ;;  %v3405_v21 = vadd.f32 %v3372_v51, %v4613_v45  ;;  %v2434_v30 = vpop.f32.mrb[11].mxu0 }
 0x1e7   : > { %2673 = vst [vmem:[%s4643_s22 + $0x28] sm:$0xff] %v2641_v23  ;;  %v2573_v52 = vmul.f32 %v3404_v37, %v4628_v22  ;;  %v3406_v53 = vadd.f32 %v2434_v30, %v4615_v39 }
 0x1e8   : > { %v2614_v59 = vadd.f32 %v4633_v28, %v2575_v57  ;;  %v2576_v32 = vmul.f32 %v3405_v21, %v4628_v22 }
 0x1e9   : > { %v2612_v18 = vadd.f32 %v4633_v28, %v2573_v52  ;;  %v2574_v62 = vmul.f32 %v3406_v53, %v4628_v22 }
 0x1ea   : > { %v2646_v33 = vmax.f32 %v2614_v59, 0.0  ;;  %v2615_v17 = vadd.f32 %v4633_v28, %v2576_v32 }
 0x1eb   : > { %v2644_v45 = vmax.f32 %v2612_v18, 0.0  ;;  %v2613_v19 = vadd.f32 %v4633_v28, %v2574_v62  ;;  %v3375_v36 = vpop.f32.mrb[12].mxu0 }
 0x1ec   : > { %2678 = vst [vmem:[%s4643_s22 + $0x50] sm:$0xff] %v2646_v33  ;;  %v2647_v0 = vmax.f32 %v2615_v17, 0.0  ;;  %v3407_v39 = vadd.f32 %v3375_v36, %v4617_v47  ;;  %v2447_v3 = vpop.f32.mrb[13].mxu0 }
 0x1ed   : > { %2676 = vst [vmem:[%s4643_s22 + $0x40] sm:$0xff] %v2644_v45  ;;  %v2645_v25 = vmax.f32 %v2613_v19, 0.0  ;;  %v3408_v60 = vadd.f32 %v2447_v3, %v4619_v27  ;;  %v3376_v9 = vpop.f32.mrb[14].mxu0 }
 0x1ee   : > { %2679 = vst [vmem:[%s4643_s22 + $0x58] sm:$0xff] %v2647_v0  ;;  %v2579_v42 = vmul.f32 %v3407_v39, %v4628_v22  ;;  %v3409_v61 = vadd.f32 %v3376_v9, %v4621_v40  ;;  %v2450_v49 = vpop.f32.mrb[15].mxu0 }
 0x1ef   : > { %2677 = vst [vmem:[%s4643_s22 + $0x48] sm:$0xff] %v2645_v25  ;;  %v2577_v26 = vmul.f32 %v3408_v60, %v4628_v22  ;;  %v3410_v46 = vadd.f32 %v2450_v49, %v4623_v55 }
 0x1f0   : > { %v3243_v24 = vpop.f32.mrb[16].mxu1  ;;  %v2618_v47 = vadd.f32 %v4633_v28, %v2579_v42  ;;  %v2580_v8 = vmul.f32 %v3409_v61, %v4628_v22 }
 0x1f1   : > { %v1627_v27 = vpop.f32.mrb[17].mxu1  ;;  %v2616_v14 = vadd.f32 %v4633_v28, %v2577_v26  ;;  %v2578_v48 = vmul.f32 %v3410_v46, %v4628_v22 }
 0x1f2   : > { %v3244_v40 = vpop.f32.mrb[18].mxu1  ;;  %v2650_v34 = vmax.f32 %v2618_v47, 0.0  ;;  %v2619_v50 = vadd.f32 %v4633_v28, %v2580_v8 }
 0x1f3   : > { %v1630_v63 = vpop.f32.mrb[19].mxu1  ;;  %v2648_v20 = vmax.f32 %v2616_v14, 0.0  ;;  %v2617_v55 = vadd.f32 %v4633_v28, %v2578_v48  ;;  %v3379_v7 = vpop.f32.mrb[16].mxu0 }
 0x1f4   : > { %2682 = vst [vmem:[%s4643_s22 + $0x70] sm:$0xff] %v2650_v34  ;;  %v2651_v44 = vmax.f32 %v2619_v50, 0.0  ;;  %v3411_v6 = vadd.f32 %v3379_v7, %v3243_v24  ;;  %v2463_v5 = vpop.f32.mrb[17].mxu0 }
 0x1f5   : > { %2680 = vst [vmem:[%s4643_s22 + $0x60] sm:$0xff] %v2648_v20  ;;  %v2649_v54 = vmax.f32 %v2617_v55, 0.0  ;;  %v3412_v1 = vadd.f32 %v2463_v5, %v1627_v27  ;;  %v3380_v11 = vpop.f32.mrb[18].mxu0 }
 0x1f6   : > { %2683 = vst [vmem:[%s4643_s22 + $0x78] sm:$0xff] %v2651_v44  ;;  %v2583_v31 = vmul.f32 %v3411_v6, %v4628_v22  ;;  %v3413_v56 = vadd.f32 %v3380_v11, %v3244_v40  ;;  %v2466_v13 = vpop.f32.mrb[19].mxu0 }
 0x1f7   : > { %2681 = vst [vmem:[%s4643_s22 + $0x68] sm:$0xff] %v2649_v54  ;;  %v2581_v38 = vmul.f32 %v3412_v1, %v4628_v22  ;;  %v3414_v35 = vadd.f32 %v2466_v13, %v1630_v63 }
 0x1f8   : > { %v3247_v43 = vpop.f32.mrb[20].mxu1  ;;  %v2622_v41 = vadd.f32 %v4633_v28, %v2583_v31  ;;  %v2584_v4 = vmul.f32 %v3413_v56, %v4628_v22 }
 0x1f9   : > { %v1643_v2 = vpop.f32.mrb[21].mxu1  ;;  %v2620_v15 = vadd.f32 %v4633_v28, %v2581_v38  ;;  %v2582_v12 = vmul.f32 %v3414_v35, %v4628_v22 }
 0x1fa   : > { %v3248_v58 = vpop.f32.mrb[22].mxu1  ;;  %v2654_v10 = vmax.f32 %v2622_v41, 0.0  ;;  %v2623_v16 = vadd.f32 %v4633_v28, %v2584_v4 }
 0x1fb   : > { %v1646_v29 = vpop.f32.mrb[23].mxu1  ;;  %v2652_v23 = vmax.f32 %v2620_v15, 0.0  ;;  %v2621_v37 = vadd.f32 %v4633_v28, %v2582_v12  ;;  %v3383_v51 = vpop.f32.mrb[20].mxu0 }
 0x1fc   : > { %2686 = vst [vmem:[%s4643_s22 + $0x90] sm:$0xff] %v2654_v10  ;;  %v2655_v57 = vmax.f32 %v2623_v16, 0.0  ;;  %v3415_v21 = vadd.f32 %v3383_v51, %v3247_v43  ;;  %v2479_v30 = vpop.f32.mrb[21].mxu0 }
 0x1fd   : > { %2684 = vst [vmem:[%s4643_s22 + $0x80] sm:$0xff] %v2652_v23  ;;  %v2653_v52 = vmax.f32 %v2621_v37, 0.0  ;;  %v3416_v53 = vadd.f32 %v2479_v30, %v1643_v2  ;;  %v3384_v59 = vpop.f32.mrb[22].mxu0 }
 0x1fe   : > { %2687 = vst [vmem:[%s4643_s22 + $0x98] sm:$0xff] %v2655_v57  ;;  %v2587_v32 = vmul.f32 %v3415_v21, %v4628_v22  ;;  %v3417_v18 = vadd.f32 %v3384_v59, %v3248_v58  ;;  %v2482_v62 = vpop.f32.mrb[23].mxu0 }
 0x1ff   : > { %2685 = vst [vmem:[%s4643_s22 + $0x88] sm:$0xff] %v2653_v52  ;;  %v2585_v33 = vmul.f32 %v3416_v53, %v4628_v22  ;;  %v3418_v17 = vadd.f32 %v2482_v62, %v1646_v29 }
 0x200   : > { %v3251_v45 = vpop.f32.mrb[24].mxu1  ;;  %v2626_v19 = vadd.f32 %v4633_v28, %v2587_v32  ;;  %v2588_v36 = vmul.f32 %v3417_v18, %v4628_v22 }
 0x201   : > { %v1659_v0 = vpop.f32.mrb[25].mxu1  ;;  %v2624_v39 = vadd.f32 %v4633_v28, %v2585_v33  ;;  %v2586_v3 = vmul.f32 %v3418_v17, %v4628_v22 }
 0x202   : > { %v3252_v25 = vpop.f32.mrb[26].mxu1  ;;  %v2658_v60 = vmax.f32 %v2626_v19, 0.0  ;;  %v2627_v9 = vadd.f32 %v4633_v28, %v2588_v36 }
 0x203   : > { %v1662_v42 = vpop.f32.mrb[27].mxu1  ;;  %v2656_v61 = vmax.f32 %v2624_v39, 0.0  ;;  %v2625_v49 = vadd.f32 %v4633_v28, %v2586_v3  ;;  %v3387_v26 = vpop.f32.mrb[24].mxu0 }
 0x204   : > { %2690 = vst [vmem:[%s4643_s22 + $0xb0] sm:$0xff] %v2658_v60  ;;  %v2659_v46 = vmax.f32 %v2627_v9, 0.0  ;;  %v3419_v24 = vadd.f32 %v3387_v26, %v3251_v45  ;;  %v2495_v47 = vpop.f32.mrb[25].mxu0 }
 0x205   : > { %2688 = vst [vmem:[%s4643_s22 + $0xa0] sm:$0xff] %v2656_v61  ;;  %v2657_v8 = vmax.f32 %v2625_v49, 0.0  ;;  %v3420_v27 = vadd.f32 %v2495_v47, %v1659_v0  ;;  %v3388_v14 = vpop.f32.mrb[26].mxu0 }
 0x206   : > { %2691 = vst [vmem:[%s4643_s22 + $0xb8] sm:$0xff] %v2659_v46  ;;  %v2591_v48 = vmul.f32 %v3419_v24, %v4628_v22  ;;  %v3421_v40 = vadd.f32 %v3388_v14, %v3252_v25  ;;  %v2498_v34 = vpop.f32.mrb[27].mxu0 }
 0x207   : > { %2689 = vst [vmem:[%s4643_s22 + $0xa8] sm:$0xff] %v2657_v8  ;;  %v2589_v50 = vmul.f32 %v3420_v27, %v4628_v22  ;;  %v3422_v63 = vadd.f32 %v2498_v34, %v1662_v42 }
 0x208   : > { %v3255_v20 = vpop.f32.mrb[28].mxu1  ;;  %v2630_v55 = vadd.f32 %v4633_v28, %v2591_v48  ;;  %v2592_v7 = vmul.f32 %v3421_v40, %v4628_v22 }
 0x209   : > { %v1675_v44 = vpop.f32.mrb[29].mxu1  ;;  %v2628_v6 = vadd.f32 %v4633_v28, %v2589_v50  ;;  %v2590_v5 = vmul.f32 %v3422_v63, %v4628_v22 }
 0x20a   : > { %v3256_v54 = vpop.f32.mrb[30].mxu1  ;;  %v2662_v1 = vmax.f32 %v2630_v55, 0.0  ;;  %v2631_v11 = vadd.f32 %v4633_v28, %v2592_v7 }
 0x20b   : > { %v1678_v31 = vpop.f32.mrb[31].mxu1  ;;  %v2660_v56 = vmax.f32 %v2628_v6, 0.0  ;;  %v2629_v13 = vadd.f32 %v4633_v28, %v2590_v5  ;;  %v3391_v38 = vpop.f32.mrb[28].mxu0 }
 0x20c   : > { %2694 = vst [vmem:[%s4643_s22 + $0xd0] sm:$0xff] %v2662_v1  ;;  %v2663_v35 = vmax.f32 %v2631_v11, 0.0  ;;  %v3423_v43 = vadd.f32 %v3391_v38, %v3255_v20  ;;  %v2511_v41 = vpop.f32.mrb[29].mxu0 }
 0x20d   : > { %2692 = vst [vmem:[%s4643_s22 + $0xc0] sm:$0xff] %v2660_v56  ;;  %v2661_v4 = vmax.f32 %v2629_v13, 0.0  ;;  %v3424_v2 = vadd.f32 %v2511_v41, %v1675_v44  ;;  %v3392_v15 = vpop.f32.mrb[30].mxu0 }
 0x20e   : > { %2695 = vst [vmem:[%s4643_s22 + $0xd8] sm:$0xff] %v2663_v35  ;;  %v2595_v12 = vmul.f32 %v3423_v43, %v4628_v22  ;;  %v3425_v58 = vadd.f32 %v3392_v15, %v3256_v54  ;;  %v2514_v10 = vpop.f32.mrb[31].mxu0 }
 0x20f   : > { %2693 = vst [vmem:[%s4643_s22 + $0xc8] sm:$0xff] %v2661_v4  ;;  %v2593_v16 = vmul.f32 %v3424_v2, %v4628_v22  ;;  %v3426_v29 = vadd.f32 %v2514_v10, %v1678_v31 }
 0x210   : > { %v2634_v23 = vadd.f32 %v4633_v28, %v2595_v12  ;;  %v2596_v37 = vmul.f32 %v3425_v58, %v4628_v22 }
 0x211   : > { %v2632_v51 = vadd.f32 %v4633_v28, %v2593_v16  ;;  %v2594_v57 = vmul.f32 %v3426_v29, %v4628_v22 }
 0x212   : > { %v2666_v21 = vmax.f32 %v2634_v23, 0.0  ;;  %v2635_v30 = vadd.f32 %v4633_v28, %v2596_v37 }
 0x213   : > { %v2664_v52 = vmax.f32 %v2632_v51, 0.0  ;;  %v2633_v53 = vadd.f32 %v4633_v28, %v2594_v57 }
 0x214   : > { %2698 = vst [vmem:[%s4643_s22 + $0xf0] sm:$0xff] %v2666_v21  ;;  %v2667_v59 = vmax.f32 %v2635_v30, 0.0 }
 0x215   : > { %2696 = vst [vmem:[%s4643_s22 + $0xe0] sm:$0xff] %v2664_v52  ;;  %v2665_v32 = vmax.f32 %v2633_v53, 0.0 }
 0x216   : > { %2699 = vst [vmem:[%s4643_s22 + $0xf8] sm:$0xff] %v2667_v59 }
 0x217   : > { %2697 = vst [vmem:[%s4643_s22 + $0xe8] sm:$0xff] %v2665_v32 }
 0x218 PF: > { %s14_s15 = sadd.s32 1, %s3716_s15  }
 0x219   : > { %p11_p4 = scmp.ge.s32.totalorder %s14_s15, 4  }
 0x21b   :  { %13 = sbr.rel (!%p11_p4) target bundleno = 1 (0x1), region = 66 }

// kernel: block_forward.2
= control target key start
LH: loop header
LB: loop body
LE: loop exit
PB: predicated region body
PF: predicated region fallthrough
CT: control target
= control target key end

     0   :  { %s3646_s12 = smov 0   ;;  %s4540_s0 = inlined_call_operand.vmem [shape: bf16[2,18,18,4], index: 0, kind: input, shape index: {}]   ;;  %s4541_s1 = inlined_call_operand.vmem [shape: bf16[36,128], index: 1, kind: input, shape index: {}]   ;;  %s4542_s2 = inlined_call_operand.vmem [shape: f32[1,128], index: 2, kind: output, shape index: {0}]   ;;  %s4543_s3 = inlined_call_operand.vmem [shape: f32[1,128], index: 3, kind: output, shape index: {1}]  }
   0x1 LB: > { %s2666_s13 = sadd.s32 4294967295, %s3623_s12   ;;  %p2669_p0 = scmp.ge.s32.totalorder %s3623_s12, 1  ;;  %s3623_s12 = sphi %s3646_s12, %s14_s12  }
   0x2   : > { %p130_p1 = scmp.lt.s32.totalorder %s3623_s12, 3 }
   0x4   : > { %p131_p2 = pnand %p2669_p0, %p130_p1 }
   0x6   : > { %134 = sbr.rel (%p131_p2) target bundleno = 557 (0x22d), region = 28 }
   0xd   : > { %p149_p3 = scmp.lt.s32.totalorder %s2666_s13, 1  ;;  %p2671_p4 = scmp.ne.s32.totalorder %s2666_s13, 0 }
   0xe   : > { %v3625_v0 = vmov (!%p2671_p4), 0.0  }
   0xf   : > { %s150_s14 = scalar_select %p149_p3, %s2666_s13, 1 }
  0x10   : > { %158 = sbr.rel (%p2671_p4) target bundleno = 23 (0x17), region = 32  ;;  %159 = vst [vmem:[%s4542_s2] sm:$0x1] (!%p2671_p4), %v3625_v0  ;;  %160 = vst [vmem:[%s4543_s3] sm:$0x1] (!%p2671_p4), %v3625_v0 }
  0x11   : > { %s3567_s15 = smul.u32 216, %s150_s14 }
  0x13   : > { %s3657_s18 = scalar_lea.vmem %s4540_s0, %s3567_s15 }
  0x17 PF: > { %v3577_v1 = vld [vmem:[%s4541_s1] ss:$0 sps:$4 sm:$0xcc]   ;;  %vm517_vm0 = vcmask 1041408   ;;  %v3671_v2 = vld [vmem:[%s4541_s1 + $0x8] sm:$0x3] }
  0x18   : > { %v3674_v3 = vld [vmem:[%s3657_s18] sm:$0xff]   ;;  %v3677_v4 = vld [vmem:[%s3657_s18 + $0x8] sm:$0x1]  ;;  %v467_v5 = vrot.slane %v3577_v1, 2  ;;  %3561 = vmatprep.subr.msk.bf16.mxu0 %vm517_vm0, %v3671_v2  ;;  %v3683_v6 = vsel %vm517_vm0, %v3671_v2, 0  ;;  %v3688_v9 = vld [vmem:[%s3657_s18 + $0xc] sm:$0xff]  }
  0x19   : > { %v4546_v7 = vunpack.c.l.bf16 %v3674_v3  ;;  %v4545_v8 = vunpack.c.h.bf16 %v3674_v3  ;;  %v3691_v10 = vld [vmem:[%s3657_s18 + $0x14] sm:$0x1]  ;;  %3130 = vmatpush3.bf16.msra.mxu0 %v3683_v6  ;;  %v4544_v11 = vunpack.c.l.bf16 %v3677_v4  ;;  %vm334_vm1 = vcmask 1046528   ;;  %v285_v14 = vld [vmem:[%s4541_s1] sm:$0x3]  ;;  %v3710_v20 = vld [vmem:[%s3657_s18 + $0x18] sm:$0xff]  }
  0x1a   : > { %v218_v12 = vunpack.c.l.bf16 %v3688_v9  ;;  %v219_v13 = vunpack.c.h.bf16 %v3688_v9  ;;  %3557 = vmatprep.subr.msk.bf16.mxu1 %vm517_vm0, %v467_v5  ;;  %v519_v15 = vsel %vm517_vm0, %v467_v5, 0  ;;  %v220_v19 = vunpack.c.l.bf16 %v3691_v10  ;;  %v3579_v21 = vld [vmem:[%s4541_s1 + $0x8] ss:$0 sps:$4 sm:$0xcc]   ;;  %v3722_v25 = vld [vmem:[%s3657_s18 + $0x20] sm:$0x1] }
  0x1b   : > { %v335_v16 = vrot.slane %v4546_v7, 1  ;;  %v336_v17 = vrot.slane %v4545_v8, 1  ;;  %2994 = vmatpush3.bf16.msra.mxu1 %v519_v15  ;;  %v338_v18 = vrot.slane %v4544_v11, 1  ;;  %vm468_vm2 = vcmask 31744   ;;  %v3733_v35 = vld [vmem:[%s3657_s18 + $0x24] sm:$0xff]   ;;  %v3743_v40 = vld [vmem:[%s3657_s18 + $0x30] sm:$0xff]  }
  0x1c   : > { %v340_v23 = vrot.slane %v218_v12, 1  ;;  %v341_v24 = vrot.slane %v219_v13, 1  ;;  %3558 = vmatprep.subr.msk.bf16.mxu1 %vm517_vm0, %v285_v14  ;;  %v343_v27 = vrot.slane %v220_v19, 1  ;;  %v221_v30 = vunpack.c.l.bf16 %v3710_v20  ;;  %v3736_v36 = vld [vmem:[%s3657_s18 + $0x2c] sm:$0x1]  ;;  %v3760_v48 = vld [vmem:[%s3657_s18 + $0x3c] sm:$0xff]  }
  0x1d   : > { %v337_v22 = vsel %vm334_vm1, %v335_v16, %v336_v17  ;;  %v339_v26 = vsel %vm334_vm1, %v336_v17, %v338_v18  ;;  %v222_v32 = vunpack.c.h.bf16 %v3710_v20  ;;  %v223_v33 = vunpack.c.l.bf16 %v3722_v25  ;;  %v3757_v47 = vld [vmem:[%s3657_s18 + $0x38] sm:$0x1]  ;;  %v3767_v53 = vld [vmem:[%s3657_s18 + $0x44] sm:$0x1]  ;;  %v3784_v62 = vld [vmem:[%s3657_s18 + $0x48] sm:$0xff]  }
  0x1e   : > { %v447_v28 = vpack.c.bf16 %v339_v26, %v337_v22  ;;  %v342_v29 = vsel %vm334_vm1, %v340_v23, %v341_v24  ;;  %v344_v31 = vsel %vm334_vm1, %v341_v24, %v343_v27  ;;  %v1696_v34 = vrot.slane %v3579_v21, 2  ;;  %v3789_v63 = vld [vmem:[%s4541_s1 + $0xc] sm:$0x3]  ;;  %v3800_v15 = vld [vmem:[%s3657_s18 + $0x50] sm:$0x1]  ;;  %v3803_v16 = vld [vmem:[%s3657_s18 + $0x54] sm:$0xff]  }
  0x1f   : > { %v448_v37 = vpack.c.bf16 %v344_v31, %v342_v29  ;;  %v345_v38 = vrot.slane %v221_v30, 1  ;;  %v731_v39 = vsel %vm517_vm0, %v285_v14, 0  ;;  %v346_v41 = vrot.slane %v222_v32, 1  ;;  %v3808_v17 = vld [vmem:[%s4541_s1 + $0x4] sm:$0x3] }
  0x20   : > { %2995 = vmatprep.mubr.msk.bf16.mxu1 %vm468_vm2, %v447_v28  ;;  %v348_v42 = vrot.slane %v223_v33, 1  ;;  %3563 = vmatprep.subr.msk.bf16.mxu0 %vm517_vm0, %v1696_v34  ;;  %v1701_v43 = vsel %vm517_vm0, %v1696_v34, 0  ;;  %v224_v44 = vunpack.c.l.bf16 %v3733_v35  ;;  %v225_v45 = vunpack.c.h.bf16 %v3733_v35  ;;  %v3826_v29 = vld [vmem:[%s3657_s18 + $0x5c] sm:$0x1] }
  0x21   : > { %3131 = vmatprep.mubr.msk.bf16.mxu0 %vm468_vm2, %v448_v37  ;;  %2996 = vmatmul.mubr.msk.bf16.vlgmr.msra.gmra.mrb[0].mxu1 %vm468_vm2, %v448_v37  ;;  %v226_v46 = vunpack.c.l.bf16 %v3736_v36  ;;  %v347_v49 = vsel %vm334_vm1, %v345_v38, %v346_v41  ;;  %v227_v51 = vunpack.c.l.bf16 %v3743_v40  ;;  %v228_v52 = vunpack.c.h.bf16 %v3743_v40 }
  0x22   : > { %v349_v50 = vsel %vm334_vm1, %v346_v41, %v348_v42  ;;  %3028 = vmatpush3.bf16.msra.mxu1 %v731_v39  ;;  %v350_v55 = vrot.slane %v224_v44, 1  ;;  %v351_v56 = vrot.slane %v225_v45, 1  ;;  %v229_v58 = vunpack.c.l.bf16 %v3757_v47 }
  0x23   : > { %v3769_v54 = vpack.c.bf16 %v349_v50, %v347_v49  ;;  %v353_v57 = vrot.slane %v226_v46, 1  ;;  %v355_v59 = vrot.slane %v227_v51, 1  ;;  %v356_v60 = vrot.slane %v228_v52, 1  ;;  %3559 = vmatprep.subr.msk.bf16.mxu1 %vm517_vm0, %v3808_v17  ;;  %v3845_v49 = vld [vmem:[%s3657_s18 + $0x60] sm:$0xff]  }
  0x24   : > { %v230_v61 = vunpack.c.l.bf16 %v3760_v48  ;;  %v352_v0 = vsel %vm334_vm1, %v350_v55, %v351_v56  ;;  %v231_v5 = vunpack.c.h.bf16 %v3760_v48  ;;  %v4562_v14 = vunpack.c.l.bf16 %v3767_v53 }
  0x25   : > { %3132 = vmatmul.mubr.msk.bf16.vlgmr.msra.gmra.mrb[0].mxu0 %vm468_vm2, %v3769_v54  ;;  %2999 = vmatprep.mubr.msk.bf16.mxu1 %vm468_vm2, %v3769_v54  ;;  %v354_v1 = vsel %vm334_vm1, %v351_v56, %v353_v57  ;;  %v357_v21 = vsel %vm334_vm1, %v355_v59, %v356_v60  ;;  %v358_v22 = vrot.slane %v229_v58, 1  ;;  %v4561_v27 = vunpack.c.l.bf16 %v3784_v62  ;;  %v3855_v59 = vld [vmem:[%s3657_s18 + $0x68] sm:$0x1] }
  0x26   : > { %3164 = vmatpush3.bf16.msra.mxu0 %v1701_v43  ;;  %v3810_v18 = vpack.c.bf16 %v354_v1, %v352_v0  ;;  %v360_v23 = vrot.slane %v230_v61, 1  ;;  %v361_v24 = vrot.slane %v231_v5, 1  ;;  %v363_v26 = vrot.slane %v4562_v14, 1 }
  0x27   : > { %v4556_v28 = vunpack.c.h.bf16 %v3784_v62  ;;  %3564 = vmatprep.subr.msk.bf16.mxu0 %vm517_vm0, %v3789_v63  ;;  %v359_v31 = vsel %vm334_vm1, %v356_v60, %v358_v22  ;;  %v4553_v34 = vunpack.c.l.bf16 %v3800_v15  ;;  %v4552_v37 = vunpack.c.l.bf16 %v3803_v16 }
  0x28   : > { %3135 = vmatprep.mubr.msk.bf16.mxu0 %vm468_vm2, %v3810_v18  ;;  %v4551_v38 = vunpack.c.h.bf16 %v3803_v16  ;;  %v3838_v39 = vpack.c.bf16 %v359_v31, %v357_v21  ;;  %v362_v41 = vsel %vm334_vm1, %v360_v23, %v361_v24  ;;  %v364_v42 = vsel %vm334_vm1, %v361_v24, %v363_v26  ;;  %v3875_v31 = vld [vmem:[%s3657_s18 + $0x6c] sm:$0xff]  }
  0x29   : > { %3000 = vmatmul.mubr.msk.bf16.gmra.mrb[4].mxu1 %vm468_vm2, %v3810_v18  ;;  %v365_v43 = vrot.slane %v4561_v27, 1  ;;  %v3847_v50 = vpack.c.bf16 %v364_v42, %v362_v41  ;;  %v366_v55 = vrot.slane %v4556_v28, 1  ;;  %v368_v56 = vrot.slane %v4553_v34, 1 }
  0x2a   : > { %v4547_v57 = vunpack.c.l.bf16 %v3826_v29  ;;  %3003 = vmatprep.mubr.msk.bf16.mxu1 %vm468_vm2, %v3838_v39  ;;  %v370_v60 = vrot.slane %v4552_v37, 1  ;;  %v371_v0 = vrot.slane %v4551_v38, 1  ;;  %v4550_v21 = vunpack.c.l.bf16 %v3845_v49 }
  0x2b   : > { %v4549_v22 = vunpack.c.h.bf16 %v3845_v49  ;;  %v367_v23 = vsel %vm334_vm1, %v365_v43, %v366_v55  ;;  %v369_v24 = vsel %vm334_vm1, %v366_v55, %v368_v56  ;;  %v4548_v26 = vunpack.c.l.bf16 %v3855_v59  ;;  %v3884_v43 = vld [vmem:[%s3657_s18 + $0x74] sm:$0x1] }
  0x2c   : > { %v373_v1 = vrot.slane %v4547_v57, 1  ;;  %v900_v41 = vrot.slane %v218_v12, 2  ;;  %v901_v42 = vrot.slane %v219_v13, 2  ;;  %v372_v11 = vsel %vm334_vm1, %v370_v60, %v371_v0  ;;  %v3895_v57 = vld [vmem:[%s3657_s18 + $0x78] sm:$0xff]   ;;  %v3898_v13 = vld [vmem:[%s3657_s18 + $0x80] sm:$0x1] }
  0x2d   : > { %3136 = vmatmul.mubr.msk.bf16.gmra.mrb[4].mxu0 %vm468_vm2, %v3838_v39  ;;  %v903_v55 = vrot.slane %v220_v19, 2  ;;  %v3888_v56 = vpack.c.bf16 %v369_v24, %v367_v23  ;;  %v375_v7 = vrot.slane %v4550_v21, 1  ;;  %v376_v12 = vrot.slane %v4549_v22, 1 }
  0x2e   : > { %3139 = vmatprep.mubr.msk.bf16.mxu0 %vm468_vm2, %v3847_v50  ;;  %v374_v8 = vsel %vm334_vm1, %v371_v0, %v373_v1  ;;  %v378_v60 = vrot.slane %v4548_v26, 1  ;;  %vm894_vm3 = vcmask 1045504   ;;  %v4555_v10 = vunpack.c.l.bf16 %v3875_v31 }
  0x2f   : > { %v4554_v19 = vunpack.c.h.bf16 %v3875_v31  ;;  %v3908_v0 = vpack.c.bf16 %v374_v8, %v372_v11  ;;  %v4560_v1 = vunpack.c.l.bf16 %v3884_v43  ;;  %v905_v23 = vrot.slane %v221_v30, 2 }
  0x30   : > { %v4558_v24 = vunpack.c.l.bf16 %v3895_v57  ;;  %v4557_v26 = vunpack.c.h.bf16 %v3895_v57  ;;  %v4559_v22 = vunpack.c.l.bf16 %v3898_v13  ;;  %v906_v21 = vrot.slane %v222_v32, 2  ;;  %v3931_v32 = vld [vmem:[%s3657_s18 + $0x84] sm:$0xff]  }
  0x31   : > { %3004 = vmatmul.mubr.msk.bf16.gmra.mrb[8].mxu1 %vm468_vm2, %v3847_v50  ;;  %v908_v38 = vrot.slane %v223_v33, 2  ;;  %v902_v8 = vsel %vm894_vm3, %v900_v41, %v901_v42  ;;  %v904_v11 = vsel %vm894_vm3, %v901_v42, %v903_v55  ;;  %v377_v30 = vsel %vm334_vm1, %v375_v7, %v376_v12  ;;  %v3934_v33 = vld [vmem:[%s3657_s18 + $0x8c] sm:$0x1] }
  0x32   : > { %3007 = vmatprep.mubr.msk.bf16.mxu1 %vm468_vm2, %v3888_v56  ;;  %v379_v37 = vsel %vm334_vm1, %v376_v12, %v378_v60  ;;  %v380_v34 = vrot.slane %v4555_v10, 1  ;;  %v381_v25 = vrot.slane %v4554_v19, 1  ;;  %v383_v41 = vrot.slane %v4560_v1, 1  ;;  %v3949_v60 = vld [vmem:[%s3657_s18 + $0x90] sm:$0xff]  }
  0x33   : > { %v3940_v7 = vpack.c.bf16 %v904_v11, %v902_v8  ;;  %v385_v42 = vrot.slane %v4558_v24, 1  ;;  %v386_v55 = vrot.slane %v4557_v26, 1  ;;  %v388_v12 = vrot.slane %v4559_v22, 1  ;;  %v3957_v11 = vld [vmem:[%s3657_s18 + $0x98] sm:$0x1] }
  0x34   : > { %v3951_v19 = vpack.c.bf16 %v379_v37, %v377_v30  ;;  %v4568_v10 = vunpack.c.l.bf16 %v3931_v32  ;;  %v4567_v28 = vunpack.c.h.bf16 %v3931_v32  ;;  %v4563_v8 = vunpack.c.l.bf16 %v3934_v33 }
  0x35   : > { %3140 = vmatmul.mubr.msk.bf16.gmra.mrb[8].mxu0 %vm468_vm2, %v3888_v56  ;;  %v382_v26 = vsel %vm334_vm1, %v380_v34, %v381_v25  ;;  %v907_v24 = vsel %vm894_vm3, %v905_v23, %v906_v21  ;;  %v909_v22 = vsel %vm894_vm3, %v906_v21, %v908_v38  ;;  %v910_v37 = vrot.slane %v224_v44, 2 }
  0x36   : > { %3143 = vmatprep.mubr.msk.bf16.mxu0 %vm468_vm2, %v3908_v0  ;;  %v384_v30 = vsel %vm334_vm1, %v381_v25, %v383_v41  ;;  %v911_v1 = vrot.slane %v225_v45, 2  ;;  %v4566_v27 = vunpack.c.l.bf16 %v3949_v60  ;;  %v4564_v14 = vunpack.c.h.bf16 %v3949_v60 }
  0x37   : > { %v387_v34 = vsel %vm334_vm1, %v385_v42, %v386_v55  ;;  %v389_v38 = vsel %vm334_vm1, %v386_v55, %v388_v12  ;;  %v913_v44 = vrot.slane %v226_v46, 2  ;;  %v4565_v21 = vunpack.c.l.bf16 %v3957_v11 }
  0x38   : > { %v390_v23 = vrot.slane %v4568_v10, 1  ;;  %v391_v45 = vrot.slane %v4567_v28, 1  ;;  %v393_v25 = vrot.slane %v4563_v8, 1  ;;  %v3986_v41 = vpack.c.bf16 %v384_v30, %v382_v26  ;;  %v4000_v8 = vld [vmem:[%s3657_s18 + $0x9c] sm:$0xff]  }
  0x39   : > { %3008 = vmatmul.mubr.msk.bf16.gmra.mrb[12].mxu1 %vm468_vm2, %v3908_v0  ;;  %v3988_v42 = vpack.c.bf16 %v909_v22, %v907_v24  ;;  %v3992_v36 = vpack.c.bf16 %v389_v38, %v387_v34  ;;  %v912_v46 = vsel %vm894_vm3, %v910_v37, %v911_v1  ;;  %v395_v55 = vrot.slane %v4566_v27, 1  ;;  %v4010_v37 = vld [vmem:[%s3657_s18 + $0xa4] sm:$0x1] }
  0x3a   : > { %3011 = vmatprep.mubr.msk.bf16.mxu1 %vm468_vm2, %v3951_v19  ;;  %v396_v12 = vrot.slane %v4564_v14, 1  ;;  %v914_v22 = vsel %vm894_vm3, %v911_v1, %v913_v44  ;;  %v915_v26 = vrot.slane %v227_v51, 2  ;;  %v916_v24 = vrot.slane %v228_v52, 2  ;;  %v4019_v44 = vld [vmem:[%s3657_s18 + $0xa8] sm:$0xff]   ;;  %v4022_v51 = vld [vmem:[%s3657_s18 + $0xb0] sm:$0x1] }
  0x3b   : > { %v398_v30 = vrot.slane %v4565_v21, 1  ;;  %v392_v34 = vsel %vm334_vm1, %v390_v23, %v391_v45  ;;  %v394_v38 = vsel %vm334_vm1, %v391_v45, %v393_v25  ;;  %v918_v14 = vrot.slane %v229_v58, 2 }
  0x3c   : > { %v920_v1 = vrot.slane %v230_v61, 2  ;;  %v921_v52 = vrot.slane %v231_v5, 2  ;;  %v4583_v23 = vunpack.c.l.bf16 %v3767_v53  ;;  %v4574_v45 = vunpack.c.l.bf16 %v4000_v8 }
  0x3d   : > { %3144 = vmatmul.mubr.msk.bf16.gmra.mrb[12].mxu0 %vm468_vm2, %v3951_v19  ;;  %v4573_v47 = vunpack.c.h.bf16 %v4000_v8  ;;  %v1902_v58 = vsel %vm517_vm0, %v3789_v63, 0  ;;  %v4036_v61 = vpack.c.bf16 %v914_v22, %v912_v46  ;;  %v397_v25 = vsel %vm334_vm1, %v395_v55, %v396_v12 }
  0x3e   : > { %3165 = vmatprep.mubr.msk.bf16.mxu0 %vm468_vm2, %v3940_v7  ;;  %v923_v21 = vrot.slane %v4583_v23, 2  ;;  %v4570_v27 = vunpack.c.l.bf16 %v4010_v37  ;;  %v399_v5 = vsel %vm334_vm1, %v396_v12, %v398_v30  ;;  %v4569_v53 = vunpack.c.l.bf16 %v4019_v44 }
  0x3f   : > { %v4572_v23 = vunpack.c.h.bf16 %v4019_v44  ;;  %v4571_v28 = vunpack.c.l.bf16 %v4022_v51  ;;  %v4044_v10 = vpack.c.bf16 %v394_v38, %v392_v34  ;;  %v917_v63 = vsel %vm894_vm3, %v915_v26, %v916_v24 }
  0x40   : > { %v919_v46 = vsel %vm894_vm3, %v916_v24, %v918_v14  ;;  %v922_v55 = vsel %vm894_vm3, %v920_v1, %v921_v52  ;;  %v924_v12 = vsel %vm894_vm3, %v921_v52, %v923_v21  ;;  %v400_v22 = vrot.slane %v4574_v45, 1  ;;  %v4071_v1 = vld [vmem:[%s3657_s18 + $0xb4] sm:$0xff]   ;;  %v4074_v52 = vld [vmem:[%s3657_s18 + $0xbc] sm:$0x1] }
  0x41   : > { %3012 = vmatmul.mubr.msk.bf16.gmra.mrb[16].mxu1 %vm468_vm2, %v3986_v41  ;;  %4584 = vst [vmem:[#allocation2_spill] sm:$0xff] %v4044_v10  ;;  %v401_v30 = vrot.slane %v4573_v47, 1  ;;  %v4058_v26 = vpack.c.bf16 %v399_v5, %v397_v25  ;;  %v403_v14 = vrot.slane %v4570_v27, 1  ;;  %v4062_v24 = vpack.c.bf16 %v919_v46, %v917_v63 }
  0x42   : > { %3015 = vmatprep.mubr.msk.bf16.mxu1 %vm468_vm2, %v3992_v36  ;;  %v405_v21 = vrot.slane %v4569_v53, 1  ;;  %v406_v34 = vrot.slane %v4572_v23, 1  ;;  %v408_v38 = vrot.slane %v4571_v28, 1  ;;  %v4585_v25 = vunpack.c.l.bf16 %v3784_v62 }
  0x43   : > { %v4586_v63 = vunpack.c.h.bf16 %v3784_v62  ;;  %v4587_v53 = vunpack.c.l.bf16 %v3800_v15  ;;  %v402_v28 = vsel %vm334_vm1, %v400_v22, %v401_v30  ;;  %v4588_v23 = vunpack.c.l.bf16 %v3803_v16 }
  0x44   : > { %v925_v5 = vrot.slane %v4585_v25, 2  ;;  %v4590_v45 = vunpack.c.l.bf16 %v3826_v29  ;;  %v404_v15 = vsel %vm334_vm1, %v401_v30, %v403_v14 }
  0x45   : > { %3166 = vmatmul.mubr.msk.bf16.vlgmr.msra.gmra.mrb[0].mxu0 %vm468_vm2, %v3988_v42  ;;  %v926_v46 = vrot.slane %v4586_v63, 2  ;;  %v928_v27 = vrot.slane %v4587_v53, 2  ;;  %v930_v47 = vrot.slane %v4588_v23, 2  ;;  %v4578_v53 = vunpack.c.l.bf16 %v4071_v1 }
  0x46   : > { %3198 = vmatpush3.bf16.msra.mxu0 %v1902_v58  ;;  %3169 = vmatprep.mubr.msk.bf16.mxu0 %vm468_vm2, %v4036_v61  ;;  %v4076_v58 = vpack.c.bf16 %v924_v12, %v922_v55  ;;  %v4589_v55 = vunpack.c.h.bf16 %v3803_v16  ;;  %v933_v25 = vrot.slane %v4590_v45, 2  ;;  %v4577_v63 = vunpack.c.h.bf16 %v4071_v1 }
  0x47   : > { %v409_v23 = vsel %vm334_vm1, %v406_v34, %v408_v38  ;;  %v4104_v29 = vpack.c.bf16 %v404_v15, %v402_v28  ;;  %v929_v45 = vsel %vm894_vm3, %v926_v46, %v928_v27  ;;  %v4592_v28 = vunpack.c.l.bf16 %v4074_v52 }
  0x48   : > { %v931_v12 = vrot.slane %v4589_v55, 2  ;;  %v927_v55 = vsel %vm894_vm3, %v925_v5, %v926_v46  ;;  %v4593_v5 = vunpack.c.l.bf16 %v3845_v49 }
  0x49   : > { %3016 = vmatmul.mubr.msk.bf16.gmra.mrb[20].mxu1 %vm468_vm2, %v4044_v10  ;;  %v407_v10 = vsel %vm334_vm1, %v405_v21, %v406_v34  ;;  %v410_v21 = vrot.slane %v4578_v53, 1  ;;  %v411_v34 = vrot.slane %v4577_v63, 1  ;;  %v413_v38 = vrot.slane %v4592_v28, 1 }
  0x4a   : > { %3019 = vmatprep.mubr.msk.bf16.mxu1 %vm468_vm2, %v4058_v26  ;;  %v932_v30 = vsel %vm894_vm3, %v930_v47, %v931_v12  ;;  %v934_v14 = vsel %vm894_vm3, %v931_v12, %v933_v25  ;;  %v4111_v22 = vpack.c.bf16 %v409_v23, %v407_v10  ;;  %v4121_v27 = vpack.c.bf16 %v929_v45, %v927_v55 }
  0x4b   : > { %v4123_v47 = vpack.c.bf16 %v934_v14, %v932_v30  ;;  %v935_v10 = vrot.slane %v4593_v5, 2  ;;  %v412_v46 = vsel %vm334_vm1, %v410_v21, %v411_v34  ;;  %v414_v12 = vsel %vm334_vm1, %v411_v34, %v413_v38  ;;  %v4144_v21 = vld [vmem:[%s4541_s1 + $0xc] ss:$0 sps:$4 sm:$0xcc]  }
  0x4c   : > { %4591 = vst [vmem:[#allocation3_spill] sm:$0xff] %v4111_v22  ;;  %v4594_v25 = vunpack.c.h.bf16 %v3845_v49  ;;  %v4595_v23 = vunpack.c.l.bf16 %v3855_v59  ;;  %v4596_v55 = vunpack.c.l.bf16 %v3875_v31  ;;  %v4597_v30 = vunpack.c.h.bf16 %v3875_v31 }
  0x4d   : > { %3170 = vmatmul.mubr.msk.bf16.gmra.mrb[4].mxu0 %vm468_vm2, %v4062_v24  ;;  %v4598_v5 = vunpack.c.l.bf16 %v3884_v43  ;;  %v4599_v34 = vunpack.c.l.bf16 %v3674_v3  ;;  %v4150_v59 = vpack.c.bf16 %v414_v12, %v412_v46  ;;  %v4581_v46 = vrot.slane %v4144_v21, 2 }
  0x4e   : > { %3173 = vmatprep.mubr.msk.bf16.mxu0 %vm468_vm2, %v4076_v58  ;;  %v936_v15 = vrot.slane %v4594_v25, 2  ;;  %v938_v28 = vrot.slane %v4595_v23, 2  ;;  %v940_v45 = vrot.slane %v4596_v55, 2  ;;  %v941_v14 = vrot.slane %v4597_v30, 2 }
  0x4f   : > { %v943_v63 = vrot.slane %v4598_v5, 2  ;;  %v895_v38 = vrot.slane %v4599_v34, 2  ;;  %v4600_v25 = vunpack.c.h.bf16 %v3674_v3  ;;  %v4601_v30 = vunpack.c.l.bf16 %v3677_v4  ;;  %3565 = vmatprep.subr.msk.bf16.mxu0 %vm517_vm0, %v4581_v46 }
  0x50   : > { %v937_v43 = vsel %vm894_vm3, %v935_v10, %v936_v15  ;;  %v939_v55 = vsel %vm894_vm3, %v936_v15, %v938_v28  ;;  %v942_v34 = vsel %vm894_vm3, %v940_v45, %v941_v14  ;;  %v4604_v15 = vunpack.c.l.bf16 %v3898_v13  ;;  %v4195_v13 = vld [vmem:[%s4541_s1 + $0x4] ss:$0 sps:$4 sm:$0xcc]  }
  0x51   : > { %3020 = vmatmul.mubr.msk.bf16.gmra.mrb[24].mxu1 %vm468_vm2, %v4104_v29  ;;  %v896_v23 = vrot.slane %v4600_v25, 2  ;;  %v898_v5 = vrot.slane %v4601_v30, 2  ;;  %v944_v53 = vsel %vm894_vm3, %v941_v14, %v943_v63  ;;  %v4165_v12 = vpack.c.bf16 %v939_v55, %v937_v43 }
  0x52   : > { %3023 = vmatprep.mubr.msk.bf16.mxu1 %vm468_vm2, %v4111_v22  ;;  %v4602_v25 = vunpack.c.l.bf16 %v3895_v57  ;;  %v4174_v4 = vpack.c.bf16 %v944_v53, %v942_v34  ;;  %v4603_v63 = vunpack.c.h.bf16 %v3895_v57  ;;  %v948_v28 = vrot.slane %v4604_v15, 2 }
  0x53   : > { %v4605_v45 = vunpack.c.l.bf16 %v3931_v32  ;;  %v4606_v43 = vunpack.c.h.bf16 %v3931_v32  ;;  %v4607_v30 = vunpack.c.l.bf16 %v3934_v33  ;;  %v4187_v46 = vsel %vm894_vm3, %v895_v38, %v896_v23 }
  0x54   : > { %v945_v22 = vrot.slane %v4602_v25, 2  ;;  %v946_v10 = vrot.slane %v4603_v63, 2  ;;  %v4582_v63 = vrot.slane %v4195_v13, 2 }
  0x55   : > { %3174 = vmatmul.mubr.msk.bf16.gmra.mrb[8].mxu0 %vm468_vm2, %v4121_v27  ;;  %v950_v14 = vrot.slane %v4605_v45, 2  ;;  %v951_v55 = vrot.slane %v4606_v43, 2  ;;  %v953_v25 = vrot.slane %v4607_v30, 2 }
  0x56   : > { %3177 = vmatprep.mubr.msk.bf16.mxu0 %vm468_vm2, %v4123_v47  ;;  %v947_v33 = vsel %vm894_vm3, %v945_v22, %v946_v10  ;;  %v949_v38 = vsel %vm894_vm3, %v946_v10, %v948_v28  ;;  %v4608_v10 = vunpack.c.l.bf16 %v3949_v60  ;;  %v4609_v28 = vunpack.c.h.bf16 %v3949_v60 }
  0x57   : > { %v954_v34 = vsel %vm894_vm3, %v951_v55, %v953_v25  ;;  %v4212_v15 = vpack.c.bf16 %v949_v38, %v947_v33  ;;  %v4612_v25 = vunpack.c.h.bf16 %v4000_v8  ;;  %v4613_v38 = vunpack.c.l.bf16 %v4010_v37 }
  0x58   : > { %v956_v45 = vrot.slane %v4609_v28, 2  ;;  %v4614_v28 = vunpack.c.l.bf16 %v4019_v44 }
  0x59   : > { %3024 = vmatmul.mubr.msk.bf16.gmra.mrb[28].mxu1 %vm468_vm2, %v4150_v59  ;;  %v961_v33 = vrot.slane %v4612_v25, 2 }
  0x5a   : > { %3029 = vmatprep.mubr.msk.bf16.mxu1 %vm468_vm2, %v3674_v3  ;;  %v4190_v3 = vsel %vm894_vm3, %v896_v23, %v898_v5  ;;  %v1073_v23 = vsel %vm517_vm0, %v3808_v17, 0  ;;  %v952_v5 = vsel %vm894_vm3, %v950_v14, %v951_v55  ;;  %v955_v17 = vrot.slane %v4608_v10, 2 }
  0x5b   : > { %v4216_v22 = vpack.c.bf16 %v954_v34, %v952_v5  ;;  %v4610_v14 = vunpack.c.l.bf16 %v3957_v11  ;;  %v4611_v55 = vunpack.c.l.bf16 %v4000_v8 }
  0x5c   : > { %v957_v11 = vsel %vm894_vm3, %v955_v17, %v956_v45 }
  0x5d   : > { %3178 = vmatmul.mubr.msk.bf16.gmra.mrb[12].mxu0 %vm468_vm2, %v4165_v12  ;;  %v958_v43 = vrot.slane %v4610_v14, 2  ;;  %v960_v30 = vrot.slane %v4611_v55, 2  ;;  %v965_v14 = vrot.slane %v4614_v28, 2  ;;  %v4615_v55 = vunpack.c.h.bf16 %v4019_v44  ;;  %v4262_v28 = vld [vmem:[%s3657_s18 + $0xc0] sm:$0xff]  }
  0x5e   : > { %3181 = vmatprep.mubr.msk.bf16.mxu0 %vm468_vm2, %v4174_v4 }
  0x5f   : > { %v959_v5 = vsel %vm894_vm3, %v956_v45, %v958_v43  ;;  %v962_v34 = vsel %vm894_vm3, %v960_v30, %v961_v33  ;;  %v966_v25 = vrot.slane %v4615_v55, 2  ;;  %v4616_v45 = vunpack.c.l.bf16 %v4022_v51  ;;  %v211_v55 = vld [vmem:[%s3657_s18 + $0xc8] sm:$0x1] }
  0x60   : > { %v4243_v10 = vpack.c.bf16 %v959_v5, %v957_v11  ;;  %v4617_v30 = vunpack.c.l.bf16 %v4071_v1  ;;  %v4619_v11 = vunpack.c.l.bf16 %v4074_v52 }
  0x61   : > { %3030 = vmatmul.mubr.msk.bf16.vlgmr.msra.gmra.mrb[0].mxu1 %vm468_vm2, %v3688_v9  ;;  %v968_v43 = vrot.slane %v4616_v45, 2  ;;  %v264_v45 = vunpack.c.h.bf16 %v4262_v28 }
  0x62   : > { %3062 = vmatpush3.bf16.msra.mxu1 %v1073_v23  ;;  %3033 = vmatprep.mubr.msk.bf16.mxu1 %vm468_vm2, %v3710_v20  ;;  %v963_v23 = vrot.slane %v4613_v38, 2  ;;  %v4618_v38 = vunpack.c.h.bf16 %v4071_v1  ;;  %v973_v5 = vrot.slane %v4619_v11, 2 }
  0x63   : > { %3560 = vmatprep.subr.msk.bf16.mxu1 %vm517_vm0, %v4582_v63  ;;  %v969_v51 = vsel %vm894_vm3, %v966_v25, %v968_v43  ;;  %v1685_v43 = vrot.slane %v264_v45, 2 }
  0x64   : > { %v964_v37 = vsel %vm894_vm3, %v961_v33, %v963_v23  ;;  %v970_v33 = vrot.slane %v4617_v30, 2  ;;  %v971_v23 = vrot.slane %v4618_v38, 2  ;;  %v265_v30 = vunpack.c.l.bf16 %v211_v55 }
  0x65   : > { %3182 = vmatmul.mubr.msk.bf16.gmra.mrb[16].mxu0 %vm468_vm2, %v4212_v15  ;;  %v4251_v17 = vpack.c.bf16 %v964_v37, %v962_v34  ;;  %v967_v34 = vsel %vm894_vm3, %v965_v14, %v966_v25  ;;  %v263_v37 = vunpack.c.l.bf16 %v4262_v28 }
  0x66   : > { %3185 = vmatprep.mubr.msk.bf16.mxu0 %vm468_vm2, %v4216_v22  ;;  %v972_v52 = vsel %vm894_vm3, %v970_v33, %v971_v23  ;;  %v974_v38 = vsel %vm894_vm3, %v971_v23, %v973_v5  ;;  %v4277_v11 = vpack.c.bf16 %v969_v51, %v967_v34  ;;  %v1687_v63 = vrot.slane %v265_v30, 2 }
  0x67   : > { %v4281_v14 = vpack.c.bf16 %v974_v38, %v972_v52  ;;  %v1684_v25 = vrot.slane %v263_v37, 2  ;;  %v1476_v55 = vrot.slane %v263_v37, 1  ;;  %v1477_v33 = vrot.slane %v264_v45, 1  ;;  %v2320_v37 = vld [vmem:[%s4541_s1 + $0x10] sm:$0x3] }
  0x68   : > { %v1479_v53 = vrot.slane %v265_v30, 1  ;;  %v1688_v5 = vsel %vm894_vm3, %v1685_v43, %v1687_v63  ;;  %v4622_v45 = vrot.slane %v4195_v13, 2 }
  0x69   : > { %3034 = vmatmul.mubr.msk.bf16.gmra.mrb[4].mxu1 %vm468_vm2, %v3733_v35  ;;  %v1686_v23 = vsel %vm894_vm3, %v1684_v25, %v1685_v43  ;;  %v1478_v34 = vsel %vm334_vm1, %v1476_v55, %v1477_v33 }
  0x6a   : > { %3037 = vmatprep.mubr.msk.bf16.mxu1 %vm468_vm2, %v3743_v40  ;;  %v1480_v51 = vsel %vm334_vm1, %v1477_v33, %v1479_v53  ;;  %v4295_v38 = vpack.c.bf16 %v1688_v5, %v1686_v23  ;;  %v4620_v53 = vrot.slane %v4144_v21, 2  ;;  %v4621_v21 = vpack.c.bf16 %v4190_v3, %v4187_v46  ;;  %v214_v3 = vld [vmem:[%s3657_s18 + $0xd4] sm:$0x1] }
  0x6b   : > { %v4291_v52 = vpack.c.bf16 %v1480_v51, %v1478_v34  ;;  %v1278_v30 = vsel %vm517_vm0, %v4622_v45, 0  ;;  %v268_v43 = vunpack.c.l.bf16 %v214_v3  ;;  %v2325_v34 = vsel %vm517_vm0, %v2320_v37, 0 }
  0x6c   : > { %v2117_v63 = vsel %vm517_vm0, %v4620_v53, 0 }
  0x6d   : > { %3186 = vmatmul.mubr.msk.bf16.gmra.mrb[20].mxu0 %vm468_vm2, %v4243_v10  ;;  %v2315_v55 = vrot.slane %v268_v43, 2 }
  0x6e   : > { %3189 = vmatprep.mubr.msk.bf16.mxu0 %vm468_vm2, %v4251_v17 }
  0x71   : > { %3038 = vmatmul.mubr.msk.bf16.gmra.mrb[8].mxu1 %vm468_vm2, %v3760_v48 }
  0x72   : > { %3041 = vmatprep.mubr.msk.bf16.mxu1 %vm468_vm2, %v3784_v62 }
  0x75   : > { %3190 = vmatmul.mubr.msk.bf16.gmra.mrb[24].mxu0 %vm468_vm2, %v4277_v11 }
  0x76   : > { %3193 = vmatprep.mubr.msk.bf16.mxu0 %vm468_vm2, %v4281_v14 }
  0x79   : > { %3042 = vmatmul.mubr.msk.bf16.gmra.mrb[12].mxu1 %vm468_vm2, %v3803_v16 }
  0x7a   : > { %3045 = vmatprep.mubr.msk.bf16.mxu1 %vm468_vm2, %v3845_v49 }
  0x7d   : > { %3194 = vmatmul.mubr.msk.bf16.gmra.mrb[28].mxu0 %vm468_vm2, %v4295_v38 }
  0x7e   : > { %3199 = vmatprep.mubr.msk.bf16.mxu0 %vm468_vm2, %v3710_v20 }
  0x81   : > { %3046 = vmatmul.mubr.msk.bf16.gmra.mrb[16].mxu1 %vm468_vm2, %v3875_v31 }
  0x82   : > { %3049 = vmatprep.mubr.msk.bf16.mxu1 %vm468_vm2, %v3895_v57 }
  0x85   : > { %3200 = vmatmul.mubr.msk.bf16.vlgmr.msra.gmra.mrb[0].mxu0 %vm468_vm2, %v3733_v35 }
  0x86   : > { %3232 = vmatpush3.bf16.msra.mxu0 %v2117_v63  ;;  %3203 = vmatprep.mubr.msk.bf16.mxu0 %vm468_vm2, %v3743_v40 }
  0x87   : > { %3566 = vmatprep.subr.msk.bf16.mxu0 %vm517_vm0, %v2320_v37 }
  0x89   : > { %3050 = vmatmul.mubr.msk.bf16.gmra.mrb[20].mxu1 %vm468_vm2, %v3931_v32 }
  0x8a   : > { %3053 = vmatprep.mubr.msk.bf16.mxu1 %vm468_vm2, %v3949_v60 }
  0x8d   : > { %3204 = vmatmul.mubr.msk.bf16.gmra.mrb[4].mxu0 %vm468_vm2, %v3760_v48 }
  0x8e   : > { %3207 = vmatprep.mubr.msk.bf16.mxu0 %vm468_vm2, %v3784_v62 }
  0x91   : > { %3054 = vmatmul.mubr.msk.bf16.gmra.mrb[24].mxu1 %vm468_vm2, %v4000_v8 }
  0x92   : > { %3057 = vmatprep.mubr.msk.bf16.mxu1 %vm468_vm2, %v4019_v44 }
  0x95   : > { %3208 = vmatmul.mubr.msk.bf16.gmra.mrb[8].mxu0 %vm468_vm2, %v3803_v16 }
  0x96   : > { %3211 = vmatprep.mubr.msk.bf16.mxu0 %vm468_vm2, %v3845_v49 }
  0x99   : > { %3058 = vmatmul.mubr.msk.bf16.gmra.mrb[28].mxu1 %vm468_vm2, %v4071_v1 }
  0x9a   : > { %3063 = vmatprep.mubr.msk.bf16.mxu1 %vm468_vm2, %v4621_v21 }
  0x9d   : > { %3212 = vmatmul.mubr.msk.bf16.gmra.mrb[12].mxu0 %vm468_vm2, %v3875_v31 }
  0x9e   : > { %3215 = vmatprep.mubr.msk.bf16.mxu0 %vm468_vm2, %v3895_v57 }
  0xa1   : > { %3064 = vmatmul.mubr.msk.bf16.vlgmr.msra.gmra.mrb[0].mxu1 %vm468_vm2, %v3940_v7 }
  0xa2   : > { %3096 = vmatpush3.bf16.msra.mxu1 %v1278_v30  ;;  %3067 = vmatprep.mubr.msk.bf16.mxu1 %vm468_vm2, %v3988_v42 }
  0xa3   : > { %3562 = vmatprep.subr.msk.bf16.mxu1 %vm517_vm0, %v3671_v2  ;;  %v212_v2 = vld [vmem:[%s3657_s18 + $0xcc] sm:$0xff]  }
  0xa4   : > { %v266_v7 = vunpack.c.l.bf16 %v212_v2  ;;  %v267_v46 = vunpack.c.h.bf16 %v212_v2 }
  0xa5   : > { %3216 = vmatmul.mubr.msk.bf16.gmra.mrb[16].mxu0 %vm468_vm2, %v3931_v32 }
  0xa6   : > { %3219 = vmatprep.mubr.msk.bf16.mxu0 %vm468_vm2, %v3949_v60  ;;  %v2312_v13 = vrot.slane %v266_v7, 2  ;;  %v2313_v25 = vrot.slane %v267_v46, 2 }
  0xa8   : > { %v4378_v33 = vsel %vm894_vm3, %v2312_v13, %v2313_v25  ;;  %v4383_v23 = vsel %vm894_vm3, %v2313_v25, %v2315_v55 }
  0xa9   : > { %3068 = vmatmul.mubr.msk.bf16.gmra.mrb[4].mxu1 %vm468_vm2, %v4036_v61  ;;  %v2319_v5 = vpack.c.bf16 %v4383_v23, %v4378_v33 }
  0xaa   : > { %3071 = vmatprep.mubr.msk.bf16.mxu1 %vm468_vm2, %v4062_v24 }
  0xad   : > { %3220 = vmatmul.mubr.msk.bf16.gmra.mrb[20].mxu0 %vm468_vm2, %v4000_v8 }
  0xae   : > { %3223 = vmatprep.mubr.msk.bf16.mxu0 %vm468_vm2, %v4019_v44 }
  0xb1   : > { %3072 = vmatmul.mubr.msk.bf16.gmra.mrb[8].mxu1 %vm468_vm2, %v4076_v58 }
  0xb2   : > { %3075 = vmatprep.mubr.msk.bf16.mxu1 %vm468_vm2, %v4121_v27 }
  0xb5   : > { %3224 = vmatmul.mubr.msk.bf16.gmra.mrb[24].mxu0 %vm468_vm2, %v4071_v1 }
  0xb6   : > { %3227 = vmatprep.mubr.msk.bf16.mxu0 %vm468_vm2, %v4262_v28 }
  0xb9   : > { %3076 = vmatmul.mubr.msk.bf16.gmra.mrb[12].mxu1 %vm468_vm2, %v4123_v47 }
  0xba   : > { %3079 = vmatprep.mubr.msk.bf16.mxu1 %vm468_vm2, %v4165_v12 }
  0xbd   : > { %3228 = vmatmul.mubr.msk.bf16.gmra.mrb[28].mxu0 %vm468_vm2, %v212_v2 }
  0xbe   : > { %3233 = vmatprep.mubr.msk.bf16.mxu0 %vm468_vm2, %v3769_v54  ;;  %v4623_v54 = vld [vmem:[#allocation2_spill] sm:$0xff] }
  0xc1   : > { %3080 = vmatmul.mubr.msk.bf16.gmra.mrb[16].mxu1 %vm468_vm2, %v4174_v4 }
  0xc2   : > { %3083 = vmatprep.mubr.msk.bf16.mxu1 %vm468_vm2, %v4212_v15 }
  0xc5   : > { %3234 = vmatmul.mubr.msk.bf16.vlgmr.msra.gmra.mrb[0].mxu0 %vm468_vm2, %v3810_v18 }
  0xc6   : > { %3266 = vmatpush3.bf16.msra.mxu0 %v2325_v34  ;;  %3237 = vmatprep.mubr.msk.bf16.mxu0 %vm468_vm2, %v3838_v39 }
  0xc9   : > { %3084 = vmatmul.mubr.msk.bf16.gmra.mrb[20].mxu1 %vm468_vm2, %v4216_v22 }
  0xca   : > { %3087 = vmatprep.mubr.msk.bf16.mxu1 %vm468_vm2, %v4243_v10 }
  0xcd   : > { %3238 = vmatmul.mubr.msk.bf16.gmra.mrb[4].mxu0 %vm468_vm2, %v3847_v50 }
  0xce   : > { %3241 = vmatprep.mubr.msk.bf16.mxu0 %vm468_vm2, %v3888_v56 }
  0xd1   : > { %3088 = vmatmul.mubr.msk.bf16.gmra.mrb[24].mxu1 %vm468_vm2, %v4251_v17 }
  0xd2   : > { %3091 = vmatprep.mubr.msk.bf16.mxu1 %vm468_vm2, %v4277_v11 }
  0xd5   : > { %3242 = vmatmul.mubr.msk.bf16.gmra.mrb[8].mxu0 %vm468_vm2, %v3908_v0 }
  0xd6   : > { %3245 = vmatprep.mubr.msk.bf16.mxu0 %vm468_vm2, %v3951_v19 }
  0xd9   : > { %3092 = vmatmul.mubr.msk.bf16.gmra.mrb[28].mxu1 %vm468_vm2, %v4281_v14 }
  0xda   : > { %3097 = vmatprep.mubr.msk.bf16.mxu1 %vm468_vm2, %v3688_v9  ;;  %v4624_v9 = vld [vmem:[#allocation3_spill] sm:$0xff] }
  0xdd   : > { %3246 = vmatmul.mubr.msk.bf16.gmra.mrb[12].mxu0 %vm468_vm2, %v3986_v41 }
  0xde   : > { %3249 = vmatprep.mubr.msk.bf16.mxu0 %vm468_vm2, %v3992_v36 }
  0xe1   : > { %3098 = vmatmul.mubr.msk.bf16.vlgmr.msra.gmra.mrb[0].mxu1 %vm468_vm2, %v3710_v20  ;;  %v2101_v20 = vrot.slane %v267_v46, 1 }
  0xe2   : > { %3300 = vmatpush3.bf16.msra.mxu1 %v3683_v6  ;;  %3101 = vmatprep.mubr.msk.bf16.mxu1 %vm468_vm2, %v3733_v35  ;;  %v2100_v6 = vrot.slane %v266_v7, 1  ;;  %v2103_v35 = vrot.slane %v268_v43, 1 }
  0xe5   : > { %3250 = vmatmul.mubr.msk.bf16.gmra.mrb[16].mxu0 %vm468_vm2, %v4623_v54 }
  0xe6   : > { %3253 = vmatprep.mubr.msk.bf16.mxu0 %vm468_vm2, %v4058_v26 }
  0xe9   : > { %3102 = vmatmul.mubr.msk.bf16.gmra.mrb[4].mxu1 %vm468_vm2, %v3743_v40  ;;  %v2102_v40 = vsel %vm334_vm1, %v2100_v6, %v2101_v20 }
  0xea   : > { %3105 = vmatprep.mubr.msk.bf16.mxu1 %vm468_vm2, %v3760_v48  ;;  %v2104_v48 = vsel %vm334_vm1, %v2101_v20, %v2103_v35 }
  0xed   : > { %3254 = vmatmul.mubr.msk.bf16.gmra.mrb[20].mxu0 %vm468_vm2, %v4104_v29 }
  0xee   : > { %3257 = vmatprep.mubr.msk.bf16.mxu0 %vm468_vm2, %v4624_v9 }
  0xf1   : > { %3106 = vmatmul.mubr.msk.bf16.gmra.mrb[8].mxu1 %vm468_vm2, %v3784_v62  ;;  %v2107_v62 = vpack.c.bf16 %v2104_v48, %v2102_v40 }
  0xf2   : > { %3109 = vmatprep.mubr.msk.bf16.mxu1 %vm468_vm2, %v3803_v16 }
  0xf5   : > { %3258 = vmatmul.mubr.msk.bf16.gmra.mrb[24].mxu0 %vm468_vm2, %v4150_v59 }
  0xf6   : > { %3261 = vmatprep.mubr.msk.bf16.mxu0 %vm468_vm2, %v4291_v52 }
  0xf9   : > { %3110 = vmatmul.mubr.msk.bf16.gmra.mrb[12].mxu1 %vm468_vm2, %v3845_v49 }
  0xfa   : > { %3113 = vmatprep.mubr.msk.bf16.mxu1 %vm468_vm2, %v3875_v31 }
  0xfd   : > { %3262 = vmatmul.mubr.msk.bf16.gmra.mrb[28].mxu0 %vm468_vm2, %v2107_v62 }
  0xfe   : > { %3267 = vmatprep.mubr.msk.bf16.mxu0 %vm468_vm2, %v3988_v42 }
 0x101   : > { %3114 = vmatmul.mubr.msk.bf16.gmra.mrb[16].mxu1 %vm468_vm2, %v3895_v57 }
 0x102   : > { %3117 = vmatprep.mubr.msk.bf16.mxu1 %vm468_vm2, %v3931_v32 }
 0x105   : > { %3268 = vmatmul.mubr.msk.bf16.vlgmr.msra.gmra.mrb[0].mxu0 %vm468_vm2, %v4036_v61 }
 0x106   : > { %3271 = vmatprep.mubr.msk.bf16.mxu0 %vm468_vm2, %v4062_v24 }
 0x109   : > { %3118 = vmatmul.mubr.msk.bf16.gmra.mrb[20].mxu1 %vm468_vm2, %v3949_v60 }
 0x10a   : > { %3121 = vmatprep.mubr.msk.bf16.mxu1 %vm468_vm2, %v4000_v8 }
 0x10d   : > { %3272 = vmatmul.mubr.msk.bf16.gmra.mrb[4].mxu0 %vm468_vm2, %v4076_v58 }
 0x10e   : > { %3275 = vmatprep.mubr.msk.bf16.mxu0 %vm468_vm2, %v4121_v27 }
 0x111   : > { %3122 = vmatmul.mubr.msk.bf16.gmra.mrb[24].mxu1 %vm468_vm2, %v4019_v44 }
 0x112   : > { %3125 = vmatprep.mubr.msk.bf16.mxu1 %vm468_vm2, %v4071_v1 }
 0x115   : > { %3276 = vmatmul.mubr.msk.bf16.gmra.mrb[8].mxu0 %vm468_vm2, %v4123_v47 }
 0x116   : > { %3279 = vmatprep.mubr.msk.bf16.mxu0 %vm468_vm2, %v4165_v12 }
 0x119   : > { %3126 = vmatmul.mubr.msk.bf16.gmra.mrb[28].mxu1 %vm468_vm2, %v4262_v28 }
 0x11a   : > { %3147 = vmatprep.mubr.msk.bf16.mxu1 %vm468_vm2, %v3986_v41 }
 0x11d   : > { %3280 = vmatmul.mubr.msk.bf16.gmra.mrb[12].mxu0 %vm468_vm2, %v4174_v4 }
 0x11e   : > { %3283 = vmatprep.mubr.msk.bf16.mxu0 %vm468_vm2, %v4212_v15 }
 0x121   : > { %3148 = vmatmul.mubr.msk.bf16.vlgmr.msra.gmra.mrb[16].mxu1 %vm468_vm2, %v3992_v36 }
 0x122   : > { %3151 = vmatprep.mubr.msk.bf16.mxu1 %vm468_vm2, %v4623_v54 }
 0x125   : > { %3284 = vmatmul.mubr.msk.bf16.gmra.mrb[16].mxu0 %vm468_vm2, %v4216_v22 }
 0x126   : > { %3287 = vmatprep.mubr.msk.bf16.mxu0 %vm468_vm2, %v4243_v10 }
 0x129   : > { %3152 = vmatmul.mubr.msk.bf16.gmra.mrb[20].mxu1 %vm468_vm2, %v4058_v26 }
 0x12a   : > { %3155 = vmatprep.mubr.msk.bf16.mxu1 %vm468_vm2, %v4104_v29 }
 0x12d   : > { %3288 = vmatmul.mubr.msk.bf16.gmra.mrb[20].mxu0 %vm468_vm2, %v4251_v17 }
 0x12e   : > { %3291 = vmatprep.mubr.msk.bf16.mxu0 %vm468_vm2, %v4277_v11 }
 0x131   : > { %3156 = vmatmul.mubr.msk.bf16.gmra.mrb[24].mxu1 %vm468_vm2, %v4624_v9 }
 0x132   : > { %3159 = vmatprep.mubr.msk.bf16.mxu1 %vm468_vm2, %v4150_v59 }
 0x135   : > { %3292 = vmatmul.mubr.msk.bf16.gmra.mrb[24].mxu0 %vm468_vm2, %v4281_v14 }
 0x136   : > { %3295 = vmatprep.mubr.msk.bf16.mxu0 %vm468_vm2, %v4295_v38 }
 0x139   : > { %3160 = vmatmul.mubr.msk.bf16.gmra.mrb[28].mxu1 %vm468_vm2, %v4291_v52 }
 0x13d   : > { %3296 = vmatmul.mubr.msk.bf16.gmra.mrb[28].mxu0 %vm468_vm2, %v2319_v5 }
 0x1b4   : > { %v3099_v16 = vpop.f32.mrb[0].mxu1 }
 0x1b5   : > { %v1314_v18 = vpop.f32.mrb[1].mxu1 }
 0x1b6   : > { %v3100_v39 = vpop.f32.mrb[2].mxu1 }
 0x1b7   : > { %v1317_v49 = vpop.f32.mrb[3].mxu1 }
 0x1bc   : > { %v3103_v50 = vpop.f32.mrb[4].mxu1 }
 0x1bd   : > { %v1330_v57 = vpop.f32.mrb[5].mxu1 }
 0x1be   : > { %v3104_v31 = vpop.f32.mrb[6].mxu1 }
 0x1bf   : > { %v1333_v56 = vpop.f32.mrb[7].mxu1 }
 0x1c4   : > { %v3107_v19 = vpop.f32.mrb[8].mxu1 }
 0x1c5   : > { %v1346_v0 = vpop.f32.mrb[9].mxu1 }
 0x1c6   : > { %v3108_v32 = vpop.f32.mrb[10].mxu1 }
 0x1c7   : > { %v1349_v60 = vpop.f32.mrb[11].mxu1 }
 0x1cc   : > { %v3111_v8 = vpop.f32.mrb[12].mxu1 }
 0x1cd   : > { %v1362_v41 = vpop.f32.mrb[13].mxu1 }
 0x1ce   : > { %v4519_v42 = vpop.f32.mrb[14].mxu1 }
 0x1cf   : > { %v4521_v36 = vpop.f32.mrb[15].mxu1 }
 0x1d8   : > { %v3269_v44 = vpop.f32.mrb[0].mxu0 }
 0x1d9   : > { %v3301_v61 = vadd.f32 %v3269_v44, %v3099_v16  ;;  %v2361_v26 = vpop.f32.mrb[1].mxu0 }
 0x1da   : > { %v3302_v24 = vadd.f32 %v2361_v26, %v1314_v18  ;;  %v3270_v1 = vpop.f32.mrb[2].mxu0 }
 0x1db   : > { %v3303_v58 = vadd.f32 %v3270_v1, %v3100_v39  ;;  %v2364_v29 = vpop.f32.mrb[3].mxu0  ;;  %v2563_v4 = vmul.f32 %v3301_v61, %v3301_v61 }
 0x1dc   : > { %v3304_v27 = vadd.f32 %v2364_v29, %v1317_v49  ;;  %v2561_v47 = vmul.f32 %v3302_v24, %v3302_v24 }
 0x1dd   : > { %v2564_v11 = vmul.f32 %v3303_v58, %v3303_v58 }
 0x1de   : > { %v2521_v59 = vadd.f32 %v3304_v27, %v3302_v24  ;;  %v2562_v12 = vmul.f32 %v3304_v27, %v3304_v27 }
 0x1e0   : > { %v2522_v15 = vadd.f32 %v3301_v61, %v2521_v59  ;;  %v2593_v22 = vadd.f32 %v2562_v12, %v2561_v47  ;;  %v3273_v10 = vpop.f32.mrb[4].mxu0 }
 0x1e1   : > { %v3305_v17 = vadd.f32 %v3273_v10, %v3103_v50  ;;  %v2377_v28 = vpop.f32.mrb[5].mxu0 }
 0x1e2   : > { %v2594_v14 = vadd.f32 %v2593_v22, %v2563_v4  ;;  %v3306_v51 = vadd.f32 %v2377_v28, %v1330_v57  ;;  %v2523_v52 = vadd.f32 %v3303_v58, %v2522_v15  ;;  %v3274_v38 = vpop.f32.mrb[6].mxu0 }
 0x1e3   : > { %v3307_v53 = vadd.f32 %v3274_v38, %v3104_v31  ;;  %v2380_v63 = vpop.f32.mrb[7].mxu0  ;;  %v2567_v3 = vmul.f32 %v3305_v17, %v3305_v17 }
 0x1e4   : > { %v2524_v37 = vadd.f32 %v3306_v51, %v2523_v52  ;;  %v2565_v21 = vmul.f32 %v3306_v51, %v3306_v51  ;;  %v2595_v45 = vadd.f32 %v2594_v14, %v2564_v11  ;;  %v3308_v30 = vadd.f32 %v2380_v63, %v1333_v56 }
 0x1e5   : > { %v2568_v23 = vmul.f32 %v3307_v53, %v3307_v53 }
 0x1e6   : > { %v2596_v2 = vadd.f32 %v2595_v45, %v2565_v21  ;;  %v2525_v7 = vadd.f32 %v3308_v30, %v2524_v37  ;;  %v2566_v46 = vmul.f32 %v3308_v30, %v3308_v30 }
 0x1e8   : > { %v2526_v13 = vadd.f32 %v3305_v17, %v2525_v7  ;;  %v2597_v25 = vadd.f32 %v2596_v2, %v2566_v46  ;;  %v3277_v43 = vpop.f32.mrb[8].mxu0 }
 0x1e9   : > { %v3309_v55 = vadd.f32 %v3277_v43, %v3107_v19  ;;  %v2393_v33 = vpop.f32.mrb[9].mxu0 }
 0x1ea   : > { %v2598_v5 = vadd.f32 %v2597_v25, %v2567_v3  ;;  %v3310_v34 = vadd.f32 %v2393_v33, %v1346_v0  ;;  %v2527_v54 = vadd.f32 %v3307_v53, %v2526_v13  ;;  %v3278_v9 = vpop.f32.mrb[10].mxu0 }
 0x1eb   : > { %v3311_v6 = vadd.f32 %v3278_v9, %v3108_v32  ;;  %v2396_v20 = vpop.f32.mrb[11].mxu0  ;;  %v2571_v49 = vmul.f32 %v3309_v55, %v3309_v55 }
 0x1ec   : > { %v2528_v35 = vadd.f32 %v3310_v34, %v2527_v54  ;;  %v2569_v40 = vmul.f32 %v3310_v34, %v3310_v34  ;;  %v2599_v48 = vadd.f32 %v2598_v5, %v2568_v23  ;;  %v3312_v62 = vadd.f32 %v2396_v20, %v1349_v60 }
 0x1ed   : > { %v2572_v44 = vmul.f32 %v3311_v6, %v3311_v6 }
 0x1ee   : > { %v2600_v16 = vadd.f32 %v2599_v48, %v2569_v40  ;;  %v2529_v18 = vadd.f32 %v3312_v62, %v2528_v35  ;;  %v2570_v39 = vmul.f32 %v3312_v62, %v3312_v62 }
 0x1f0   : > { %v2530_v50 = vadd.f32 %v3309_v55, %v2529_v18  ;;  %v2601_v57 = vadd.f32 %v2600_v16, %v2570_v39  ;;  %v3281_v31 = vpop.f32.mrb[12].mxu0 }
 0x1f1   : > { %v3313_v56 = vadd.f32 %v3281_v31, %v3111_v8  ;;  %v2409_v19 = vpop.f32.mrb[13].mxu0 }
 0x1f2   : > { %v2602_v61 = vadd.f32 %v2601_v57, %v2571_v49  ;;  %v3314_v0 = vadd.f32 %v2409_v19, %v1362_v41  ;;  %v2531_v26 = vadd.f32 %v3311_v6, %v2530_v50  ;;  %v3282_v24 = vpop.f32.mrb[14].mxu0 }
 0x1f3   : > { %v3315_v32 = vadd.f32 %v3282_v24, %v4519_v42  ;;  %v2412_v1 = vpop.f32.mrb[15].mxu0  ;;  %v2575_v10 = vmul.f32 %v3313_v56, %v3313_v56 }
 0x1f4   : > { %v2532_v58 = vadd.f32 %v3314_v0, %v2531_v26  ;;  %v2573_v29 = vmul.f32 %v3314_v0, %v3314_v0  ;;  %v2603_v60 = vadd.f32 %v2602_v61, %v2572_v44  ;;  %v3316_v27 = vadd.f32 %v2412_v1, %v4521_v36  ;;  %v3149_v47 = vpop.f32.mrb[16].mxu1 }
 0x1f5   : > { %v1589_v59 = vpop.f32.mrb[17].mxu1  ;;  %v2576_v42 = vmul.f32 %v3315_v32, %v3315_v32 }
 0x1f6   : > { %v2604_v12 = vadd.f32 %v2603_v60, %v2573_v29  ;;  %v2533_v4 = vadd.f32 %v3316_v27, %v2532_v58  ;;  %v2574_v15 = vmul.f32 %v3316_v27, %v3316_v27  ;;  %v3150_v8 = vpop.f32.mrb[18].mxu1 }
 0x1f7   : > { %v1592_v22 = vpop.f32.mrb[19].mxu1 }
 0x1f8   : > { %v2534_v17 = vadd.f32 %v3313_v56, %v2533_v4  ;;  %v2605_v41 = vadd.f32 %v2604_v12, %v2574_v15  ;;  %v3285_v28 = vpop.f32.mrb[16].mxu0 }
 0x1f9   : > { %v3317_v11 = vadd.f32 %v3285_v28, %v3149_v47  ;;  %v2425_v14 = vpop.f32.mrb[17].mxu0 }
 0x1fa   : > { %v2606_v51 = vadd.f32 %v2605_v41, %v2575_v10  ;;  %v3318_v52 = vadd.f32 %v2425_v14, %v1589_v59  ;;  %v2535_v38 = vadd.f32 %v3315_v32, %v2534_v17  ;;  %v3286_v53 = vpop.f32.mrb[18].mxu0 }
 0x1fb   : > { %v3319_v63 = vadd.f32 %v3286_v53, %v3150_v8  ;;  %v2428_v36 = vpop.f32.mrb[19].mxu0  ;;  %v2579_v55 = vmul.f32 %v3317_v11, %v3317_v11 }
 0x1fc   : > { %v2536_v37 = vadd.f32 %v3318_v52, %v2535_v38  ;;  %v2577_v21 = vmul.f32 %v3318_v52, %v3318_v52  ;;  %v2607_v45 = vadd.f32 %v2606_v51, %v2576_v42  ;;  %v3320_v30 = vadd.f32 %v2428_v36, %v1592_v22  ;;  %v3153_v2 = vpop.f32.mrb[20].mxu1 }
 0x1fd   : > { %v1605_v7 = vpop.f32.mrb[21].mxu1  ;;  %v2580_v9 = vmul.f32 %v3319_v63, %v3319_v63 }
 0x1fe   : > { %v2608_v46 = vadd.f32 %v2607_v45, %v2577_v21  ;;  %v2537_v3 = vadd.f32 %v3320_v30, %v2536_v37  ;;  %v2578_v13 = vmul.f32 %v3320_v30, %v3320_v30  ;;  %v3154_v25 = vpop.f32.mrb[22].mxu1 }
 0x1ff   : > { %v1608_v43 = vpop.f32.mrb[23].mxu1 }
 0x200   : > { %v2538_v33 = vadd.f32 %v3317_v11, %v2537_v3  ;;  %v2609_v23 = vadd.f32 %v2608_v46, %v2578_v13  ;;  %v3289_v5 = vpop.f32.mrb[20].mxu0 }
 0x201   : > { %v3321_v34 = vadd.f32 %v3289_v5, %v3153_v2  ;;  %v2441_v54 = vpop.f32.mrb[21].mxu0 }
 0x202   : > { %v2610_v6 = vadd.f32 %v2609_v23, %v2579_v55  ;;  %v3322_v20 = vadd.f32 %v2441_v54, %v1605_v7  ;;  %v2539_v35 = vadd.f32 %v3319_v63, %v2538_v33  ;;  %v3290_v40 = vpop.f32.mrb[22].mxu0 }
 0x203   : > { %v3323_v48 = vadd.f32 %v3290_v40, %v3154_v25  ;;  %v2444_v62 = vpop.f32.mrb[23].mxu0  ;;  %v2583_v0 = vmul.f32 %v3321_v34, %v3321_v34 }
 0x204   : > { %v2540_v16 = vadd.f32 %v3322_v20, %v2539_v35  ;;  %v2581_v18 = vmul.f32 %v3322_v20, %v3322_v20  ;;  %v2611_v39 = vadd.f32 %v2610_v6, %v2580_v9  ;;  %v3324_v49 = vadd.f32 %v2444_v62, %v1608_v43  ;;  %v3157_v50 = vpop.f32.mrb[24].mxu1 }
 0x205   : > { %v1621_v57 = vpop.f32.mrb[25].mxu1  ;;  %v2584_v29 = vmul.f32 %v3323_v48, %v3323_v48 }
 0x206   : > { %v2612_v31 = vadd.f32 %v2611_v39, %v2581_v18  ;;  %v2541_v56 = vadd.f32 %v3324_v49, %v2540_v16  ;;  %v2582_v19 = vmul.f32 %v3324_v49, %v3324_v49  ;;  %v3158_v44 = vpop.f32.mrb[26].mxu1 }
 0x207   : > { %v1624_v61 = vpop.f32.mrb[27].mxu1 }
 0x208   : > { %v2542_v26 = vadd.f32 %v3321_v34, %v2541_v56  ;;  %v2613_v24 = vadd.f32 %v2612_v31, %v2582_v19  ;;  %v3293_v32 = vpop.f32.mrb[24].mxu0  ;;  %v2520_v56 = vld [vmem:[%s4542_s2] sm:$0x1] }
 0x209   : > { %v3325_v1 = vadd.f32 %v3293_v32, %v3157_v50  ;;  %v2457_v58 = vpop.f32.mrb[25].mxu0 }
 0x20a   : > { %v2614_v60 = vadd.f32 %v2613_v24, %v2583_v0  ;;  %v3326_v27 = vadd.f32 %v2457_v58, %v1621_v57  ;;  %v2543_v47 = vadd.f32 %v3323_v48, %v2542_v26  ;;  %v3294_v59 = vpop.f32.mrb[26].mxu0 }
 0x20b   : > { %v3327_v12 = vadd.f32 %v3294_v59, %v3158_v44  ;;  %v2460_v4 = vpop.f32.mrb[27].mxu0  ;;  %v2587_v52 = vmul.f32 %v3325_v1, %v3325_v1 }
 0x20c   : > { %v2544_v15 = vadd.f32 %v3326_v27, %v2543_v47  ;;  %v2585_v8 = vmul.f32 %v3326_v27, %v3326_v27  ;;  %v2615_v22 = vadd.f32 %v2614_v60, %v2584_v29  ;;  %v3328_v10 = vadd.f32 %v2460_v4, %v1624_v61  ;;  %v3161_v17 = vpop.f32.mrb[28].mxu1  ;;  %v2560_v61 = vld [vmem:[%s4543_s3] sm:$0x1] }
 0x20d   : > { %v1637_v41 = vpop.f32.mrb[29].mxu1  ;;  %v2588_v21 = vmul.f32 %v3327_v12, %v3327_v12 }
 0x20e   : > { %v2616_v28 = vadd.f32 %v2615_v22, %v2585_v8  ;;  %v2545_v11 = vadd.f32 %v3328_v10, %v2544_v15  ;;  %v2586_v14 = vmul.f32 %v3328_v10, %v3328_v10  ;;  %v3162_v42 = vpop.f32.mrb[30].mxu1 }
 0x20f   : > { %v1640_v51 = vpop.f32.mrb[31].mxu1 }
 0x210   : > { %v2546_v38 = vadd.f32 %v3325_v1, %v2545_v11  ;;  %v2617_v53 = vadd.f32 %v2616_v28, %v2586_v14  ;;  %v3297_v63 = vpop.f32.mrb[28].mxu0 }
 0x211   : > { %v3329_v36 = vadd.f32 %v3297_v63, %v3161_v17  ;;  %v2473_v37 = vpop.f32.mrb[29].mxu0 }
 0x212   : > { %v2618_v45 = vadd.f32 %v2617_v53, %v2587_v52  ;;  %v3330_v30 = vadd.f32 %v2473_v37, %v1637_v41  ;;  %v2547_v2 = vadd.f32 %v3327_v12, %v2546_v38  ;;  %v3298_v7 = vpop.f32.mrb[30].mxu0 }
 0x213   : > { %v3331_v46 = vadd.f32 %v3298_v7, %v3162_v42  ;;  %v2476_v3 = vpop.f32.mrb[31].mxu0  ;;  %v2591_v34 = vmul.f32 %v3329_v36, %v3329_v36 }
 0x214   : > { %v2548_v13 = vadd.f32 %v3330_v30, %v2547_v2  ;;  %v2589_v25 = vmul.f32 %v3330_v30, %v3330_v30  ;;  %v2619_v43 = vadd.f32 %v2618_v45, %v2588_v21  ;;  %v3332_v55 = vadd.f32 %v2476_v3, %v1640_v51 }
 0x215   : > { %v2592_v6 = vmul.f32 %v3331_v46, %v3331_v46 }
 0x216   : > { %v2620_v33 = vadd.f32 %v2619_v43, %v2589_v25  ;;  %v2549_v23 = vadd.f32 %v3332_v55, %v2548_v13  ;;  %v2590_v5 = vmul.f32 %v3332_v55, %v3332_v55 }
 0x218   : > { %v2550_v54 = vadd.f32 %v3329_v36, %v2549_v23  ;;  %v2621_v9 = vadd.f32 %v2620_v33, %v2590_v5 }
 0x21a   : > { %v2551_v20 = vadd.f32 %v3331_v46, %v2550_v54  ;;  %v2622_v35 = vadd.f32 %v2621_v9, %v2591_v34 }
 0x21c   : > { %v2552_v40 = vrot.slane %v2551_v20, 4  ;;  %v2623_v48 = vadd.f32 %v2622_v35, %v2592_v6 }
 0x21e   : > { %v2553_v62 = vadd.f32 %v2552_v40, %v2551_v20  ;;  %v2624_v16 = vrot.slane %v2623_v48, 4 }
 0x220   : > { %v2554_v18 = vrot.slane %v2553_v62, 2  ;;  %v2625_v39 = vadd.f32 %v2624_v16, %v2623_v48 }
 0x222   : > { %v2555_v49 = vadd.f32 %v2554_v18, %v2553_v62  ;;  %v2626_v50 = vrot.slane %v2625_v39, 2 }
 0x224   : > { %v2556_v57 = vrot.slane %v2555_v49, 1  ;;  %v2627_v31 = vadd.f32 %v2626_v50, %v2625_v39 }
 0x226   : > { %v2557_v19 = vadd.f32 %v2556_v57, %v2555_v49  ;;  %v2628_v44 = vrot.slane %v2627_v31, 1 }
 0x228   : > { %v2558_v0 = vadd.f32 %v2557_v19, %v2520_v56  ;;  %v2629_v26 = vadd.f32 %v2628_v44, %v2627_v31 }
 0x22a   : > { %2559 = vst [vmem:[%s4542_s2] sm:$0x1] %v2558_v0  ;;  %v2630_v24 = vadd.f32 %v2629_v26, %v2560_v61 }
 0x22c   : > { %2631 = vst [vmem:[%s4543_s3] sm:$0x1] %v2630_v24 }
 0x22d PF: > { %s14_s12 = sadd.s32 1, %s3623_s12  }
 0x22e   : > { %p11_p5 = scmp.ge.s32.totalorder %s14_s12, 4  }
 0x230   :  { %13 = sbr.rel (!%p11_p5) target bundleno = 1 (0x1), region = 66 }

</bundles_post_ra>
